<compile_context>
chip_gen: v7x
topology: tpu7x:2x2x1
jax: 0.10.0
libtpu: 0.0.40
codegen_flags: <defaults>
</compile_context>

<pallas_src>
import functools

import numpy as np
import jax
import jax.numpy as jnp
from jax.experimental import pallas as pl
from jax.experimental.pallas import tpu as pltpu


# ---------------------------------------------------------------------------
# Host-side layout preprocessing (band matrices for convs, selection matrices
# for max-pool) -- turns every in-kernel op into a plain 2-D matmul.
# ---------------------------------------------------------------------------
def _conv_band_matrices(wq, w_in):
    """(Cout,Cin,KH,KW) conv weights -> KH banded matrices B[kh] of shape
    (W_in*Cin, Wo*Cout) so that, with activations stored as (H, W*Cin),
        conv(act)[ho, wo*Cout+co] == sum_kh (act[kh:kh+Ho, :] @ B[kh])[ho, wo*Cout+co]
    (cross-correlation, same as nn.Conv2d)."""
    cout, cin, kh_, kw_ = wq.shape
    wo = w_in - kw_ + 1
    band = np.zeros((kh_, w_in * cin, wo * cout), np.float32)
    for kh in range(kh_):
        for o in range(wo):
            for kw in range(kw_):
                w = o + kw
                band[kh, w * cin:(w + 1) * cin, o * cout:(o + 1) * cout] = \
                    wq[:, :, kh, kw].T
    return band


def _pool_h_select(h):
    """(2, h//2, h) 0/1 matrices picking even/odd rows (left-multiply)."""
    hp = h // 2
    s = np.zeros((2, hp, h), np.float32)
    for p in range(2):
        s[p, np.arange(hp), 2 * np.arange(hp) + p] = 1.0
    return s


def _pool_w_select(w, c):
    """(2, w*c, (w//2)*c) 0/1 matrices picking even/odd W positions per channel
    (right-multiply on the (H, W*C) activation layout)."""
    wp = w // 2
    s = np.zeros((2, w * c, wp * c), np.float32)
    for p in range(2):
        for o in range(wp):
            for ci in range(c):
                s[p, (2 * o + p) * c + ci, o * c + ci] = 1.0
    return s


# ---------------------------------------------------------------------------
# The fused Pallas kernel (one grid step == one batch element)
# ---------------------------------------------------------------------------
def _lenet_fused_kernel(x_ref, b1_ref, b3_ref, b5_ref, wf6_ref, wout_ref,
                        s2h_ref, s2w_ref, s4h_ref, s4w_ref,
                        o_ref, xq_ref, a1_ref, a2_ref,
                        *, input_scale, qs_c1, qs_c3, qs_c5, qs_f6, qs_out):
    f32 = jnp.float32
    bf16 = jnp.bfloat16

    def quant(acc, qscale, relu):
        # y = clamp(floor((round(scale*2^16) * acc) >> 16), -128, 127)
        if relu:
            acc = jnp.maximum(acc, 0.0)
        return jnp.clip(jnp.floor((qscale * acc) / 65536.0), -128.0, 127.0)

    def conv(act_ref, band_ref):
        # act_ref: (H, W*Cin) f32 scratch; band_ref: (KH, W*Cin, Wo*Cout) bf16.
        kh_tot = band_ref.shape[0]
        ho = act_ref.shape[0] - kh_tot + 1
        acc = jnp.zeros((ho, band_ref.shape[2]), f32)
        for kh in range(kh_tot):
            acc = acc + jnp.dot(act_ref[kh:kh + ho, :].astype(bf16),
                                band_ref[kh],
                                preferred_element_type=f32)
        return acc

    def pool(y, sh_ref, sw_ref):
        # 2x2 max-pool via even/odd selection matmuls (values are exact ints).
        yb = y.astype(bf16)
        rows = jnp.maximum(
            jnp.dot(sh_ref[0], yb, preferred_element_type=f32),
            jnp.dot(sh_ref[1], yb, preferred_element_type=f32)).astype(bf16)
        return jnp.maximum(
            jnp.dot(rows, sw_ref[0], preferred_element_type=f32),
            jnp.dot(rows, sw_ref[1], preferred_element_type=f32))

    # Input quantization: floor(input_scale * x).clamp(-128, 127)
    xq_ref[...] = jnp.clip(jnp.floor(input_scale * x_ref[0]), -128.0, 127.0)

    # c1 + ReLU + scale/clamp, s2
    y = quant(conv(xq_ref, b1_ref), qs_c1, True)            # (28, 28*6)
    a1_ref[...] = pool(y, s2h_ref, s2w_ref)                  # (14, 14*6)

    # c3 + ReLU + scale/clamp, s4
    y = quant(conv(a1_ref, b3_ref), qs_c3, True)             # (10, 10*16)
    a2_ref[...] = pool(y, s4h_ref, s4w_ref)                  # (5, 5*16)

    # c5 + ReLU + scale/clamp  (spatially 1x1 -> row vector == torch.flatten(x, 1))
    y = quant(conv(a2_ref, b5_ref), qs_c5, True).astype(bf16)   # (1, 120)

    # f6 + ReLU + scale/clamp
    y = quant(jnp.dot(y, wf6_ref[...], preferred_element_type=f32),
              qs_f6, True).astype(bf16)                         # (1, 84)

    # output + scale/clamp (no ReLU); columns 10..127 are zero padding
    y = quant(jnp.dot(y, wout_ref[...], preferred_element_type=f32),
              qs_out, False)                                    # (1, 128)
    o_ref[0, :, :] = y


# ---------------------------------------------------------------------------
# Wrapper: build kernel parameters and run the fused kernel
# ---------------------------------------------------------------------------
def build_kernel_params(wq):
    """wq: dict of quantized (integer-valued) float weights in PyTorch layout."""
    bf = jnp.bfloat16
    wout_pad = np.zeros((84, 128), np.float32)
    wout_pad[:, :10] = wq["output"].T
    host = {
        "b1": _conv_band_matrices(wq["c1"], 32),    # (5, 32, 168)
        "b3": _conv_band_matrices(wq["c3"], 14),    # (5, 84, 160)
        "b5": _conv_band_matrices(wq["c5"], 5),     # (5, 80, 120)
        "wf6": np.ascontiguousarray(wq["f6"].T),    # (120, 84)
        "wout": wout_pad,                           # (84, 128)  lane-dense output
        "s2h": _pool_h_select(28),                  # (2, 14, 28)
        "s2w": _pool_w_select(28, 6),               # (2, 168, 84)
        "s4h": _pool_h_select(10),                  # (2, 5, 10)
        "s4w": _pool_w_select(10, 16),              # (2, 160, 80)
    }
    # All entries are integers (or 0/1) in [-128,127] -> exact in bf16.
    return {k: jnp.asarray(v, bf) for k, v in host.items()}


def net_quantized_forward(x_nchw, kp, scales):
    B = x_nchw.shape[0]
    assert x_nchw.shape[1:] == (1, 32, 32)
    x = x_nchw[:, 0, :, :]                          # (B, 32, 32), Cin == 1

    kernel = functools.partial(
        _lenet_fused_kernel,
        input_scale=float(scales["input"]),
        qs_c1=float(scales["c1"]), qs_c3=float(scales["c3"]),
        qs_c5=float(scales["c5"]), qs_f6=float(scales["f6"]),
        qs_out=float(scales["output"]))

    def wspec(arr):
        shape = tuple(arr.shape)
        return pl.BlockSpec(shape, lambda b, _n=len(shape): (0,) * _n)

    out = pl.pallas_call(
        kernel,
        out_shape=jax.ShapeDtypeStruct((B, 1, 128), jnp.float32),
        grid=(B,),
        in_specs=[pl.BlockSpec((1, 32, 32), lambda b: (b, 0, 0)),
                  wspec(kp["b1"]), wspec(kp["b3"]), wspec(kp["b5"]),
                  wspec(kp["wf6"]), wspec(kp["wout"]),
                  wspec(kp["s2h"]), wspec(kp["s2w"]),
                  wspec(kp["s4h"]), wspec(kp["s4w"])],
        out_specs=pl.BlockSpec((1, 1, 128), lambda b: (b, 0, 0)),
        scratch_shapes=[pltpu.VMEM((32, 32), jnp.float32),   # quantized input
                        pltpu.VMEM((14, 84), jnp.float32),   # after s2
                        pltpu.VMEM((5, 80), jnp.float32)],   # after s4
        compiler_params=pltpu.CompilerParams(
            dimension_semantics=("parallel",)),
    )(x, kp["b1"], kp["b3"], kp["b5"], kp["wf6"], kp["wout"],
      kp["s2h"], kp["s2w"], kp["s4h"], kp["s4w"])

    return out[:, 0, :10]


# ---------------------------------------------------------------------------
# Reference helpers (numpy): im2col / weight layout / maxpool
# ---------------------------------------------------------------------------
def _im2col_np(x_nhwc, KH, KW):
    B, H, W, C = x_nhwc.shape
    Ho, Wo = H - KH + 1, W - KW + 1
    cols = [x_nhwc[:, kh:kh + Ho, kw:kw + Wo, :] for kh in range(KH) for kw in range(KW)]
    p = np.stack(cols, axis=3)
    return p.reshape(B * Ho * Wo, KH * KW * C), (B, Ho, Wo)


def _conv_w_to_matrix(w):  # (Cout, Cin, KH, KW) -> (KH*KW*Cin, Cout)
    Cout, Cin, KH, KW = w.shape
    return np.transpose(w, (2, 3, 1, 0)).reshape(KH * KW * Cin, Cout)


def _maxpool_np(y):
    return np.maximum(np.maximum(y[:, ::2, ::2, :], y[:, ::2, 1::2, :]),
                      np.maximum(y[:, 1::2, ::2, :], y[:, 1::2, 1::2, :]))


# ---------------------------------------------------------------------------
# Quantization setup (faithful to the module's static methods)
# ---------------------------------------------------------------------------
def _abs_max(a):
    a = np.asarray(a)
    hi, lo = a.max(), a.min()
    return hi if hi > abs(lo) else abs(lo)


def quantize_initial_input(pixels):
    return (2 ** 8 - 1) / (2.0 * _abs_max(pixels))


def quantize_activations(activations, n_w, n_initial_input, ns):
    n_oa = (2 ** 8 - 1) / (2.0 * _abs_max(activations))
    n_i = n_initial_input
    for (a, b) in ns:
        n_i = n_i * a * b
    return n_oa / (n_w * n_i)


def quantize_weights(w_float):
    n_w = (2 ** 8 - 1) / (2.0 * _abs_max(w_float))
    w_q = np.clip(np.round(w_float * n_w), -128, 127)
    return w_q.astype(np.float32), float(n_w)


def float_calibration_forward(x_nchw, float_ws):
    """Float LeNet forward pass; its per-layer outputs play the role of `outAct`."""
    x = np.transpose(np.asarray(x_nchw, np.float64), (0, 2, 3, 1))
    outacts = []

    def conv(z, w, relu=True):
        p, (B, Ho, Wo) = _im2col_np(z, w.shape[2], w.shape[3])
        a = p @ _conv_w_to_matrix(w)
        if relu:
            a = np.maximum(a, 0.0)
        return a.reshape(B, Ho, Wo, -1)

    y = conv(x, float_ws["c1"]); outacts.append(y); y = _maxpool_np(y)
    y = conv(y, float_ws["c3"]); outacts.append(y); y = _maxpool_np(y)
    y = conv(y, float_ws["c5"]); outacts.append(y)
    y = y.reshape(y.shape[0], -1)
    y = np.maximum(y @ float_ws["f6"].T, 0.0); outacts.append(y)
    y = y @ float_ws["output"].T; outacts.append(y)
    return outacts


# ---------------------------------------------------------------------------
# Pure-numpy (float32) reference of the quantized forward, same op ordering
# ---------------------------------------------------------------------------
def reference_quantized_forward(x_nchw, wq, scales):
    f32 = np.float32
    x = np.asarray(x_nchw, f32)
    x = np.clip(np.floor(f32(scales["input"]) * x), -128.0, 127.0).astype(f32)
    x = np.transpose(x, (0, 2, 3, 1))

    def qlayer(x2d, w, qs, relu):
        a = (x2d.astype(f32) @ np.asarray(w, f32)).astype(f32)
        if relu:
            a = np.maximum(a, f32(0.0))
        a = np.floor((f32(qs) * a) / f32(65536.0))
        return np.clip(a, -128.0, 127.0).astype(f32)

    p, (B, Ho, Wo) = _im2col_np(x, 5, 5)
    y = qlayer(p, _conv_w_to_matrix(wq["c1"]), scales["c1"], True).reshape(B, Ho, Wo, -1)
    y = _maxpool_np(y)
    p, (B, Ho, Wo) = _im2col_np(y, 5, 5)
    y = qlayer(p, _conv_w_to_matrix(wq["c3"]), scales["c3"], True).reshape(B, Ho, Wo, -1)
    y = _maxpool_np(y)
    p, (B, Ho, Wo) = _im2col_np(y, 5, 5)
    y = qlayer(p, _conv_w_to_matrix(wq["c5"]), scales["c5"], True).reshape(B, Ho, Wo, -1)
    y = y.reshape(B, -1)
    y = qlayer(y, wq["f6"].T, scales["f6"], True)
    y = qlayer(y, wq["output"].T, scales["output"], False)
    return y


# ---------------------------------------------------------------------------
# Main
# ---------------------------------------------------------------------------
if __name__ == "__main__":
    key = jax.random.PRNGKey(0)
    kx, k1, k3, k5, k6, ko = jax.random.split(key, 6)

    B = 2
    # MNIST-like pixels in [0, 1); NCHW as the PyTorch module expects.
    x = jax.random.uniform(kx, (B, 1, 32, 32), jnp.float32)
    x_np = np.asarray(x)

    # Deterministic float weights for the underlying LeNet-5 (bias-free).
    float_ws = {
        "c1": np.asarray(jax.random.normal(k1, (6, 1, 5, 5)) * 0.2, np.float64),
        "c3": np.asarray(jax.random.normal(k3, (16, 6, 5, 5)) * 0.1, np.float64),
        "c5": np.asarray(jax.random.normal(k5, (120, 16, 5, 5)) * 0.05, np.float64),
        "f6": np.asarray(jax.random.normal(k6, (84, 120)) * 0.1, np.float64),
        "output": np.asarray(jax.random.normal(ko, (10, 84)) * 0.1, np.float64),
    }

    # Weight quantization (layer[0].weight and layer[0].weight.scale).
    wq, nw = {}, {}
    for name, wf in float_ws.items():
        wq[name], nw[name] = quantize_weights(wf)

    # Activation calibration: inAct of c1 == network input pixels; outAct from float net.
    input_scale = quantize_initial_input(x_np)
    outacts = float_calibration_forward(x_np, float_ws)
    ns, scales = [], {"input": float(input_scale)}
    for name, oa in zip(("c1", "c3", "c5", "f6", "output"), outacts):
        s = quantize_activations(oa, nw[name], input_scale, ns)
        scales[name] = float(np.round(s * 2 ** 16))     # scale = round(scale*2^16)
        ns.append((nw[name], s))

    # Kernel parameters (banded conv weights, pooling selection matrices, bf16).
    kp = build_kernel_params(wq)

    out = net_quantized_forward(x, kp, scales)
    out = jax.block_until_ready(out)

    ref = reference_quantized_forward(x_np, wq, scales)
    assert out.shape == (B, 10), out.shape
    np.testing.assert_allclose(np.asarray(out), ref, rtol=0, atol=0)

    print("KERNEL_OK")
</pallas_src>

<mosaic_0001>
module attributes {stable_mosaic.version = 11 : i64} {
  func.func @_lenet_fused_kernel(%arg0: i32, %arg1: memref<1x32x32xf32, #tpu.memory_space<vmem>>, %arg2: memref<5x32x168xbf16, #tpu.memory_space<vmem>>, %arg3: memref<5x84x160xbf16, #tpu.memory_space<vmem>>, %arg4: memref<5x80x120xbf16, #tpu.memory_space<vmem>>, %arg5: memref<120x84xbf16, #tpu.memory_space<vmem>>, %arg6: memref<84x128xbf16, #tpu.memory_space<vmem>>, %arg7: memref<2x14x28xbf16, #tpu.memory_space<vmem>>, %arg8: memref<2x168x84xbf16, #tpu.memory_space<vmem>>, %arg9: memref<2x5x10xbf16, #tpu.memory_space<vmem>>, %arg10: memref<2x160x80xbf16, #tpu.memory_space<vmem>>, %arg11: memref<1x1x128xf32, #tpu.memory_space<vmem>>, %arg12: memref<32x32xf32, #tpu.memory_space<vmem>>, %arg13: memref<14x84xf32, #tpu.memory_space<vmem>>, %arg14: memref<5x80xf32, #tpu.memory_space<vmem>>) attributes {dimension_semantics = [#tpu.dimension_semantics<parallel>], iteration_bounds = array<i64: 2>, scalar_prefetch = 0 : i64, scratch_operands = 3 : i64, tpu.core_type = #tpu.core_type<tc>, window_params = [{transform_indices = @transform_0, window_bounds = array<i64: 1, 32, 32>}, {pipeline_mode = #tpu.pipeline_mode<synchronous>, transform_indices = @transform_1, window_bounds = array<i64: 5, 32, 168>}, {pipeline_mode = #tpu.pipeline_mode<synchronous>, transform_indices = @transform_2, window_bounds = array<i64: 5, 84, 160>}, {pipeline_mode = #tpu.pipeline_mode<synchronous>, transform_indices = @transform_3, window_bounds = array<i64: 5, 80, 120>}, {pipeline_mode = #tpu.pipeline_mode<synchronous>, transform_indices = @transform_4, window_bounds = array<i64: 120, 84>}, {pipeline_mode = #tpu.pipeline_mode<synchronous>, transform_indices = @transform_5, window_bounds = array<i64: 84, 128>}, {pipeline_mode = #tpu.pipeline_mode<synchronous>, transform_indices = @transform_6, window_bounds = array<i64: 2, 14, 28>}, {pipeline_mode = #tpu.pipeline_mode<synchronous>, transform_indices = @transform_7, window_bounds = array<i64: 2, 168, 84>}, {pipeline_mode = #tpu.pipeline_mode<synchronous>, transform_indices = @transform_8, window_bounds = array<i64: 2, 5, 10>}, {pipeline_mode = #tpu.pipeline_mode<synchronous>, transform_indices = @transform_9, window_bounds = array<i64: 2, 160, 80>}, {transform_indices = @transform_10, window_bounds = array<i64: 1, 1, 128>}]} {
    %c0 = arith.constant 0 : index
    %c0_0 = arith.constant 0 : index
    %c0_1 = arith.constant 0 : index
    %0 = vector.load %arg1[%c0, %c0_0, %c0_1] : memref<1x32x32xf32, #tpu.memory_space<vmem>>, vector<1x32x32xf32>
    %1 = vector.shape_cast %0 : vector<1x32x32xf32> to vector<32x32xf32>
    %cst = arith.constant 127.556992 : f32
    %2 = vector.broadcast %cst : f32 to vector<32x32xf32>
    %3 = arith.mulf %2, %1 : vector<32x32xf32>
    %4 = math.floor %3 : vector<32x32xf32>
    %cst_2 = arith.constant -1.280000e+02 : f32
    %cst_3 = arith.constant 1.270000e+02 : f32
    %5 = vector.broadcast %cst_2 : f32 to vector<32x32xf32>
    %6 = arith.maximumf %5, %4 : vector<32x32xf32>
    %7 = vector.broadcast %cst_3 : f32 to vector<32x32xf32>
    %8 = arith.minimumf %7, %6 : vector<32x32xf32>
    %c0_4 = arith.constant 0 : index
    %c0_5 = arith.constant 0 : index
    %9 = vector.load %arg12[%c0_4, %c0_5] : memref<32x32xf32, #tpu.memory_space<vmem>>, vector<32x32xf32>
    tpu.vector_store %arg12[%c0_4, %c0_5], %8 {strides = array<i32>} : memref<32x32xf32, #tpu.memory_space<vmem>>, vector<32x32xf32>,
    %cst_6 = arith.constant 0.000000e+00 : f32
    %10 = vector.broadcast %cst_6 : f32 to vector<28x168xf32>
    %c0_7 = arith.constant 0 : index
    %c0_8 = arith.constant 0 : index
    %11 = vector.load %arg12[%c0_7, %c0_8] : memref<32x32xf32, #tpu.memory_space<vmem>>, vector<28x32xf32>
    %12 = arith.truncf %11 : vector<28x32xf32> to vector<28x32xbf16>
    %c0_9 = arith.constant 0 : index
    %c0_10 = arith.constant 0 : index
    %c0_11 = arith.constant 0 : index
    %13 = vector.load %arg2[%c0_9, %c0_10, %c0_11] : memref<5x32x168xbf16, #tpu.memory_space<vmem>>, vector<1x32x168xbf16>
    %14 = vector.shape_cast %13 : vector<1x32x168xbf16> to vector<32x168xbf16>
    %cst_12 = arith.constant dense<0.000000e+00> : vector<28x168xf32>
    %15 = tpu.matmul %12, %14, %cst_12 {dimension_numbers = #tpu.dot_dimension_numbers<[1], [0], [0], [1], [0, 0, 1, 1], [], []>} : vector<28x32xbf16>, vector<32x168xbf16>, vector<28x168xf32> -> vector<28x168xf32>
    %16 = arith.addf %10, %15 : vector<28x168xf32>
    %c1 = arith.constant 1 : index
    %c0_13 = arith.constant 0 : index
    %17 = vector.load %arg12[%c1, %c0_13] : memref<32x32xf32, #tpu.memory_space<vmem>>, vector<28x32xf32>
    %18 = arith.truncf %17 : vector<28x32xf32> to vector<28x32xbf16>
    %c1_14 = arith.constant 1 : index
    %c0_15 = arith.constant 0 : index
    %c0_16 = arith.constant 0 : index
    %19 = vector.load %arg2[%c1_14, %c0_15, %c0_16] : memref<5x32x168xbf16, #tpu.memory_space<vmem>>, vector<1x32x168xbf16>
    %20 = vector.shape_cast %19 : vector<1x32x168xbf16> to vector<32x168xbf16>
    %cst_17 = arith.constant dense<0.000000e+00> : vector<28x168xf32>
    %21 = tpu.matmul %18, %20, %cst_17 {dimension_numbers = #tpu.dot_dimension_numbers<[1], [0], [0], [1], [0, 0, 1, 1], [], []>} : vector<28x32xbf16>, vector<32x168xbf16>, vector<28x168xf32> -> vector<28x168xf32>
    %22 = arith.addf %16, %21 : vector<28x168xf32>
    %c2 = arith.constant 2 : index
    %c0_18 = arith.constant 0 : index
    %23 = vector.load %arg12[%c2, %c0_18] : memref<32x32xf32, #tpu.memory_space<vmem>>, vector<28x32xf32>
    %24 = arith.truncf %23 : vector<28x32xf32> to vector<28x32xbf16>
    %c2_19 = arith.constant 2 : index
    %c0_20 = arith.constant 0 : index
    %c0_21 = arith.constant 0 : index
    %25 = vector.load %arg2[%c2_19, %c0_20, %c0_21] : memref<5x32x168xbf16, #tpu.memory_space<vmem>>, vector<1x32x168xbf16>
    %26 = vector.shape_cast %25 : vector<1x32x168xbf16> to vector<32x168xbf16>
    %cst_22 = arith.constant dense<0.000000e+00> : vector<28x168xf32>
    %27 = tpu.matmul %24, %26, %cst_22 {dimension_numbers = #tpu.dot_dimension_numbers<[1], [0], [0], [1], [0, 0, 1, 1], [], []>} : vector<28x32xbf16>, vector<32x168xbf16>, vector<28x168xf32> -> vector<28x168xf32>
    %28 = arith.addf %22, %27 : vector<28x168xf32>
    %c3 = arith.constant 3 : index
    %c0_23 = arith.constant 0 : index
    %29 = vector.load %arg12[%c3, %c0_23] : memref<32x32xf32, #tpu.memory_space<vmem>>, vector<28x32xf32>
    %30 = arith.truncf %29 : vector<28x32xf32> to vector<28x32xbf16>
    %c3_24 = arith.constant 3 : index
    %c0_25 = arith.constant 0 : index
    %c0_26 = arith.constant 0 : index
    %31 = vector.load %arg2[%c3_24, %c0_25, %c0_26] : memref<5x32x168xbf16, #tpu.memory_space<vmem>>, vector<1x32x168xbf16>
    %32 = vector.shape_cast %31 : vector<1x32x168xbf16> to vector<32x168xbf16>
    %cst_27 = arith.constant dense<0.000000e+00> : vector<28x168xf32>
    %33 = tpu.matmul %30, %32, %cst_27 {dimension_numbers = #tpu.dot_dimension_numbers<[1], [0], [0], [1], [0, 0, 1, 1], [], []>} : vector<28x32xbf16>, vector<32x168xbf16>, vector<28x168xf32> -> vector<28x168xf32>
    %34 = arith.addf %28, %33 : vector<28x168xf32>
    %c4 = arith.constant 4 : index
    %c0_28 = arith.constant 0 : index
    %35 = vector.load %arg12[%c4, %c0_28] : memref<32x32xf32, #tpu.memory_space<vmem>>, vector<28x32xf32>
    %36 = arith.truncf %35 : vector<28x32xf32> to vector<28x32xbf16>
    %c4_29 = arith.constant 4 : index
    %c0_30 = arith.constant 0 : index
    %c0_31 = arith.constant 0 : index
    %37 = vector.load %arg2[%c4_29, %c0_30, %c0_31] : memref<5x32x168xbf16, #tpu.memory_space<vmem>>, vector<1x32x168xbf16>
    %38 = vector.shape_cast %37 : vector<1x32x168xbf16> to vector<32x168xbf16>
    %cst_32 = arith.constant dense<0.000000e+00> : vector<28x168xf32>
    %39 = tpu.matmul %36, %38, %cst_32 {dimension_numbers = #tpu.dot_dimension_numbers<[1], [0], [0], [1], [0, 0, 1, 1], [], []>} : vector<28x32xbf16>, vector<32x168xbf16>, vector<28x168xf32> -> vector<28x168xf32>
    %40 = arith.addf %34, %39 : vector<28x168xf32>
    %cst_33 = arith.constant 0.000000e+00 : f32
    %41 = vector.broadcast %cst_33 : f32 to vector<28x168xf32>
    %42 = arith.maximumf %40, %41 : vector<28x168xf32>
    %cst_34 = arith.constant 1.770000e+02 : f32
    %43 = vector.broadcast %cst_34 : f32 to vector<28x168xf32>
    %44 = arith.mulf %43, %42 : vector<28x168xf32>
    %cst_35 = arith.constant 6.553600e+04 : f32
    %45 = vector.broadcast %cst_35 : f32 to vector<28x168xf32>
    %46 = arith.divf %44, %45 : vector<28x168xf32>
    %47 = math.floor %46 : vector<28x168xf32>
    %cst_36 = arith.constant -1.280000e+02 : f32
    %cst_37 = arith.constant 1.270000e+02 : f32
    %48 = vector.broadcast %cst_36 : f32 to vector<28x168xf32>
    %49 = arith.maximumf %48, %47 : vector<28x168xf32>
    %50 = vector.broadcast %cst_37 : f32 to vector<28x168xf32>
    %51 = arith.minimumf %50, %49 : vector<28x168xf32>
    %52 = arith.truncf %51 : vector<28x168xf32> to vector<28x168xbf16>
    %c0_38 = arith.constant 0 : index
    %c0_39 = arith.constant 0 : index
    %c0_40 = arith.constant 0 : index
    %53 = vector.load %arg7[%c0_38, %c0_39, %c0_40] : memref<2x14x28xbf16, #tpu.memory_space<vmem>>, vector<1x14x28xbf16>
    %54 = vector.shape_cast %53 : vector<1x14x28xbf16> to vector<14x28xbf16>
    %cst_41 = arith.constant dense<0.000000e+00> : vector<14x168xf32>
    %55 = tpu.matmul %54, %52, %cst_41 {dimension_numbers = #tpu.dot_dimension_numbers<[1], [0], [0], [1], [0, 0, 1, 1], [], []>} : vector<14x28xbf16>, vector<28x168xbf16>, vector<14x168xf32> -> vector<14x168xf32>
    %c1_42 = arith.constant 1 : index
    %c0_43 = arith.constant 0 : index
    %c0_44 = arith.constant 0 : index
    %56 = vector.load %arg7[%c1_42, %c0_43, %c0_44] : memref<2x14x28xbf16, #tpu.memory_space<vmem>>, vector<1x14x28xbf16>
    %57 = vector.shape_cast %56 : vector<1x14x28xbf16> to vector<14x28xbf16>
    %cst_45 = arith.constant dense<0.000000e+00> : vector<14x168xf32>
    %58 = tpu.matmul %57, %52, %cst_45 {dimension_numbers = #tpu.dot_dimension_numbers<[1], [0], [0], [1], [0, 0, 1, 1], [], []>} : vector<14x28xbf16>, vector<28x168xbf16>, vector<14x168xf32> -> vector<14x168xf32>
    %59 = arith.maximumf %55, %58 : vector<14x168xf32>
    %60 = arith.truncf %59 : vector<14x168xf32> to vector<14x168xbf16>
    %c0_46 = arith.constant 0 : index
    %c0_47 = arith.constant 0 : index
    %c0_48 = arith.constant 0 : index
    %61 = vector.load %arg8[%c0_46, %c0_47, %c0_48] : memref<2x168x84xbf16, #tpu.memory_space<vmem>>, vector<1x168x84xbf16>
    %62 = vector.shape_cast %61 : vector<1x168x84xbf16> to vector<168x84xbf16>
    %cst_49 = arith.constant dense<0.000000e+00> : vector<14x84xf32>
    %63 = tpu.matmul %60, %62, %cst_49 {dimension_numbers = #tpu.dot_dimension_numbers<[1], [0], [0], [1], [0, 0, 1, 1], [], []>} : vector<14x168xbf16>, vector<168x84xbf16>, vector<14x84xf32> -> vector<14x84xf32>
    %c1_50 = arith.constant 1 : index
    %c0_51 = arith.constant 0 : index
    %c0_52 = arith.constant 0 : index
    %64 = vector.load %arg8[%c1_50, %c0_51, %c0_52] : memref<2x168x84xbf16, #tpu.memory_space<vmem>>, vector<1x168x84xbf16>
    %65 = vector.shape_cast %64 : vector<1x168x84xbf16> to vector<168x84xbf16>
    %cst_53 = arith.constant dense<0.000000e+00> : vector<14x84xf32>
    %66 = tpu.matmul %60, %65, %cst_53 {dimension_numbers = #tpu.dot_dimension_numbers<[1], [0], [0], [1], [0, 0, 1, 1], [], []>} : vector<14x168xbf16>, vector<168x84xbf16>, vector<14x84xf32> -> vector<14x84xf32>
    %67 = arith.maximumf %63, %66 : vector<14x84xf32>
    %c0_54 = arith.constant 0 : index
    %c0_55 = arith.constant 0 : index
    %68 = vector.load %arg13[%c0_54, %c0_55] : memref<14x84xf32, #tpu.memory_space<vmem>>, vector<14x84xf32>
    tpu.vector_store %arg13[%c0_54, %c0_55], %67 {strides = array<i32>} : memref<14x84xf32, #tpu.memory_space<vmem>>, vector<14x84xf32>,
    %cst_56 = arith.constant 0.000000e+00 : f32
    %69 = vector.broadcast %cst_56 : f32 to vector<10x160xf32>
    %c0_57 = arith.constant 0 : index
    %c0_58 = arith.constant 0 : index
    %70 = vector.load %arg13[%c0_57, %c0_58] : memref<14x84xf32, #tpu.memory_space<vmem>>, vector<10x84xf32>
    %71 = arith.truncf %70 : vector<10x84xf32> to vector<10x84xbf16>
    %c0_59 = arith.constant 0 : index
    %c0_60 = arith.constant 0 : index
    %c0_61 = arith.constant 0 : index
    %72 = vector.load %arg3[%c0_59, %c0_60, %c0_61] : memref<5x84x160xbf16, #tpu.memory_space<vmem>>, vector<1x84x160xbf16>
    %73 = vector.shape_cast %72 : vector<1x84x160xbf16> to vector<84x160xbf16>
    %cst_62 = arith.constant dense<0.000000e+00> : vector<10x160xf32>
    %74 = tpu.matmul %71, %73, %cst_62 {dimension_numbers = #tpu.dot_dimension_numbers<[1], [0], [0], [1], [0, 0, 1, 1], [], []>} : vector<10x84xbf16>, vector<84x160xbf16>, vector<10x160xf32> -> vector<10x160xf32>
    %75 = arith.addf %69, %74 : vector<10x160xf32>
    %c1_63 = arith.constant 1 : index
    %c0_64 = arith.constant 0 : index
    %76 = vector.load %arg13[%c1_63, %c0_64] : memref<14x84xf32, #tpu.memory_space<vmem>>, vector<10x84xf32>
    %77 = arith.truncf %76 : vector<10x84xf32> to vector<10x84xbf16>
    %c1_65 = arith.constant 1 : index
    %c0_66 = arith.constant 0 : index
    %c0_67 = arith.constant 0 : index
    %78 = vector.load %arg3[%c1_65, %c0_66, %c0_67] : memref<5x84x160xbf16, #tpu.memory_space<vmem>>, vector<1x84x160xbf16>
    %79 = vector.shape_cast %78 : vector<1x84x160xbf16> to vector<84x160xbf16>
    %cst_68 = arith.constant dense<0.000000e+00> : vector<10x160xf32>
    %80 = tpu.matmul %77, %79, %cst_68 {dimension_numbers = #tpu.dot_dimension_numbers<[1], [0], [0], [1], [0, 0, 1, 1], [], []>} : vector<10x84xbf16>, vector<84x160xbf16>, vector<10x160xf32> -> vector<10x160xf32>
    %81 = arith.addf %75, %80 : vector<10x160xf32>
    %c2_69 = arith.constant 2 : index
    %c0_70 = arith.constant 0 : index
    %82 = vector.load %arg13[%c2_69, %c0_70] : memref<14x84xf32, #tpu.memory_space<vmem>>, vector<10x84xf32>
    %83 = arith.truncf %82 : vector<10x84xf32> to vector<10x84xbf16>
    %c2_71 = arith.constant 2 : index
    %c0_72 = arith.constant 0 : index
    %c0_73 = arith.constant 0 : index
    %84 = vector.load %arg3[%c2_71, %c0_72, %c0_73] : memref<5x84x160xbf16, #tpu.memory_space<vmem>>, vector<1x84x160xbf16>
    %85 = vector.shape_cast %84 : vector<1x84x160xbf16> to vector<84x160xbf16>
    %cst_74 = arith.constant dense<0.000000e+00> : vector<10x160xf32>
    %86 = tpu.matmul %83, %85, %cst_74 {dimension_numbers = #tpu.dot_dimension_numbers<[1], [0], [0], [1], [0, 0, 1, 1], [], []>} : vector<10x84xbf16>, vector<84x160xbf16>, vector<10x160xf32> -> vector<10x160xf32>
    %87 = arith.addf %81, %86 : vector<10x160xf32>
    %c3_75 = arith.constant 3 : index
    %c0_76 = arith.constant 0 : index
    %88 = vector.load %arg13[%c3_75, %c0_76] : memref<14x84xf32, #tpu.memory_space<vmem>>, vector<10x84xf32>
    %89 = arith.truncf %88 : vector<10x84xf32> to vector<10x84xbf16>
    %c3_77 = arith.constant 3 : index
    %c0_78 = arith.constant 0 : index
    %c0_79 = arith.constant 0 : index
    %90 = vector.load %arg3[%c3_77, %c0_78, %c0_79] : memref<5x84x160xbf16, #tpu.memory_space<vmem>>, vector<1x84x160xbf16>
    %91 = vector.shape_cast %90 : vector<1x84x160xbf16> to vector<84x160xbf16>
    %cst_80 = arith.constant dense<0.000000e+00> : vector<10x160xf32>
    %92 = tpu.matmul %89, %91, %cst_80 {dimension_numbers = #tpu.dot_dimension_numbers<[1], [0], [0], [1], [0, 0, 1, 1], [], []>} : vector<10x84xbf16>, vector<84x160xbf16>, vector<10x160xf32> -> vector<10x160xf32>
    %93 = arith.addf %87, %92 : vector<10x160xf32>
    %c4_81 = arith.constant 4 : index
    %c0_82 = arith.constant 0 : index
    %94 = vector.load %arg13[%c4_81, %c0_82] : memref<14x84xf32, #tpu.memory_space<vmem>>, vector<10x84xf32>
    %95 = arith.truncf %94 : vector<10x84xf32> to vector<10x84xbf16>
    %c4_83 = arith.constant 4 : index
    %c0_84 = arith.constant 0 : index
    %c0_85 = arith.constant 0 : index
    %96 = vector.load %arg3[%c4_83, %c0_84, %c0_85] : memref<5x84x160xbf16, #tpu.memory_space<vmem>>, vector<1x84x160xbf16>
    %97 = vector.shape_cast %96 : vector<1x84x160xbf16> to vector<84x160xbf16>
    %cst_86 = arith.constant dense<0.000000e+00> : vector<10x160xf32>
    %98 = tpu.matmul %95, %97, %cst_86 {dimension_numbers = #tpu.dot_dimension_numbers<[1], [0], [0], [1], [0, 0, 1, 1], [], []>} : vector<10x84xbf16>, vector<84x160xbf16>, vector<10x160xf32> -> vector<10x160xf32>
    %99 = arith.addf %93, %98 : vector<10x160xf32>
    %cst_87 = arith.constant 0.000000e+00 : f32
    %100 = vector.broadcast %cst_87 : f32 to vector<10x160xf32>
    %101 = arith.maximumf %99, %100 : vector<10x160xf32>
    %cst_88 = arith.constant 2.540000e+02 : f32
    %102 = vector.broadcast %cst_88 : f32 to vector<10x160xf32>
    %103 = arith.mulf %102, %101 : vector<10x160xf32>
    %cst_89 = arith.constant 6.553600e+04 : f32
    %104 = vector.broadcast %cst_89 : f32 to vector<10x160xf32>
    %105 = arith.divf %103, %104 : vector<10x160xf32>
    %106 = math.floor %105 : vector<10x160xf32>
    %cst_90 = arith.constant -1.280000e+02 : f32
    %cst_91 = arith.constant 1.270000e+02 : f32
    %107 = vector.broadcast %cst_90 : f32 to vector<10x160xf32>
    %108 = arith.maximumf %107, %106 : vector<10x160xf32>
    %109 = vector.broadcast %cst_91 : f32 to vector<10x160xf32>
    %110 = arith.minimumf %109, %108 : vector<10x160xf32>
    %111 = arith.truncf %110 : vector<10x160xf32> to vector<10x160xbf16>
    %c0_92 = arith.constant 0 : index
    %c0_93 = arith.constant 0 : index
    %c0_94 = arith.constant 0 : index
    %112 = vector.load %arg9[%c0_92, %c0_93, %c0_94] : memref<2x5x10xbf16, #tpu.memory_space<vmem>>, vector<1x5x10xbf16>
    %113 = vector.shape_cast %112 : vector<1x5x10xbf16> to vector<5x10xbf16>
    %cst_95 = arith.constant dense<0.000000e+00> : vector<5x160xf32>
    %114 = tpu.matmul %113, %111, %cst_95 {dimension_numbers = #tpu.dot_dimension_numbers<[1], [0], [0], [1], [0, 0, 1, 1], [], []>} : vector<5x10xbf16>, vector<10x160xbf16>, vector<5x160xf32> -> vector<5x160xf32>
    %c1_96 = arith.constant 1 : index
    %c0_97 = arith.constant 0 : index
    %c0_98 = arith.constant 0 : index
    %115 = vector.load %arg9[%c1_96, %c0_97, %c0_98] : memref<2x5x10xbf16, #tpu.memory_space<vmem>>, vector<1x5x10xbf16>
    %116 = vector.shape_cast %115 : vector<1x5x10xbf16> to vector<5x10xbf16>
    %cst_99 = arith.constant dense<0.000000e+00> : vector<5x160xf32>
    %117 = tpu.matmul %116, %111, %cst_99 {dimension_numbers = #tpu.dot_dimension_numbers<[1], [0], [0], [1], [0, 0, 1, 1], [], []>} : vector<5x10xbf16>, vector<10x160xbf16>, vector<5x160xf32> -> vector<5x160xf32>
    %118 = arith.maximumf %114, %117 : vector<5x160xf32>
    %119 = arith.truncf %118 : vector<5x160xf32> to vector<5x160xbf16>
    %c0_100 = arith.constant 0 : index
    %c0_101 = arith.constant 0 : index
    %c0_102 = arith.constant 0 : index
    %120 = vector.load %arg10[%c0_100, %c0_101, %c0_102] : memref<2x160x80xbf16, #tpu.memory_space<vmem>>, vector<1x160x80xbf16>
    %121 = vector.shape_cast %120 : vector<1x160x80xbf16> to vector<160x80xbf16>
    %cst_103 = arith.constant dense<0.000000e+00> : vector<5x80xf32>
    %122 = tpu.matmul %119, %121, %cst_103 {dimension_numbers = #tpu.dot_dimension_numbers<[1], [0], [0], [1], [0, 0, 1, 1], [], []>} : vector<5x160xbf16>, vector<160x80xbf16>, vector<5x80xf32> -> vector<5x80xf32>
    %c1_104 = arith.constant 1 : index
    %c0_105 = arith.constant 0 : index
    %c0_106 = arith.constant 0 : index
    %123 = vector.load %arg10[%c1_104, %c0_105, %c0_106] : memref<2x160x80xbf16, #tpu.memory_space<vmem>>, vector<1x160x80xbf16>
    %124 = vector.shape_cast %123 : vector<1x160x80xbf16> to vector<160x80xbf16>
    %cst_107 = arith.constant dense<0.000000e+00> : vector<5x80xf32>
    %125 = tpu.matmul %119, %124, %cst_107 {dimension_numbers = #tpu.dot_dimension_numbers<[1], [0], [0], [1], [0, 0, 1, 1], [], []>} : vector<5x160xbf16>, vector<160x80xbf16>, vector<5x80xf32> -> vector<5x80xf32>
    %126 = arith.maximumf %122, %125 : vector<5x80xf32>
    %c0_108 = arith.constant 0 : index
    %c0_109 = arith.constant 0 : index
    %127 = vector.load %arg14[%c0_108, %c0_109] : memref<5x80xf32, #tpu.memory_space<vmem>>, vector<5x80xf32>
    tpu.vector_store %arg14[%c0_108, %c0_109], %126 {strides = array<i32>} : memref<5x80xf32, #tpu.memory_space<vmem>>, vector<5x80xf32>,
    %cst_110 = arith.constant 0.000000e+00 : f32
    %128 = vector.broadcast %cst_110 : f32 to vector<1x120xf32>
    %c0_111 = arith.constant 0 : index
    %c0_112 = arith.constant 0 : index
    %129 = vector.load %arg14[%c0_111, %c0_112] : memref<5x80xf32, #tpu.memory_space<vmem>>, vector<1x80xf32>
    %130 = arith.truncf %129 : vector<1x80xf32> to vector<1x80xbf16>
    %c0_113 = arith.constant 0 : index
    %c0_114 = arith.constant 0 : index
    %c0_115 = arith.constant 0 : index
    %131 = vector.load %arg4[%c0_113, %c0_114, %c0_115] : memref<5x80x120xbf16, #tpu.memory_space<vmem>>, vector<1x80x120xbf16>
    %132 = vector.shape_cast %131 : vector<1x80x120xbf16> to vector<80x120xbf16>
    %cst_116 = arith.constant dense<0.000000e+00> : vector<1x120xf32>
    %133 = tpu.matmul %130, %132, %cst_116 {dimension_numbers = #tpu.dot_dimension_numbers<[1], [0], [0], [1], [0, 0, 1, 1], [], []>} : vector<1x80xbf16>, vector<80x120xbf16>, vector<1x120xf32> -> vector<1x120xf32>
    %134 = arith.addf %128, %133 : vector<1x120xf32>
    %c1_117 = arith.constant 1 : index
    %c0_118 = arith.constant 0 : index
    %135 = vector.load %arg14[%c1_117, %c0_118] : memref<5x80xf32, #tpu.memory_space<vmem>>, vector<1x80xf32>
    %136 = arith.truncf %135 : vector<1x80xf32> to vector<1x80xbf16>
    %c1_119 = arith.constant 1 : index
    %c0_120 = arith.constant 0 : index
    %c0_121 = arith.constant 0 : index
    %137 = vector.load %arg4[%c1_119, %c0_120, %c0_121] : memref<5x80x120xbf16, #tpu.memory_space<vmem>>, vector<1x80x120xbf16>
    %138 = vector.shape_cast %137 : vector<1x80x120xbf16> to vector<80x120xbf16>
    %cst_122 = arith.constant dense<0.000000e+00> : vector<1x120xf32>
    %139 = tpu.matmul %136, %138, %cst_122 {dimension_numbers = #tpu.dot_dimension_numbers<[1], [0], [0], [1], [0, 0, 1, 1], [], []>} : vector<1x80xbf16>, vector<80x120xbf16>, vector<1x120xf32> -> vector<1x120xf32>
    %140 = arith.addf %134, %139 : vector<1x120xf32>
    %c2_123 = arith.constant 2 : index
    %c0_124 = arith.constant 0 : index
    %141 = vector.load %arg14[%c2_123, %c0_124] : memref<5x80xf32, #tpu.memory_space<vmem>>, vector<1x80xf32>
    %142 = arith.truncf %141 : vector<1x80xf32> to vector<1x80xbf16>
    %c2_125 = arith.constant 2 : index
    %c0_126 = arith.constant 0 : index
    %c0_127 = arith.constant 0 : index
    %143 = vector.load %arg4[%c2_125, %c0_126, %c0_127] : memref<5x80x120xbf16, #tpu.memory_space<vmem>>, vector<1x80x120xbf16>
    %144 = vector.shape_cast %143 : vector<1x80x120xbf16> to vector<80x120xbf16>
    %cst_128 = arith.constant dense<0.000000e+00> : vector<1x120xf32>
    %145 = tpu.matmul %142, %144, %cst_128 {dimension_numbers = #tpu.dot_dimension_numbers<[1], [0], [0], [1], [0, 0, 1, 1], [], []>} : vector<1x80xbf16>, vector<80x120xbf16>, vector<1x120xf32> -> vector<1x120xf32>
    %146 = arith.addf %140, %145 : vector<1x120xf32>
    %c3_129 = arith.constant 3 : index
    %c0_130 = arith.constant 0 : index
    %147 = vector.load %arg14[%c3_129, %c0_130] : memref<5x80xf32, #tpu.memory_space<vmem>>, vector<1x80xf32>
    %148 = arith.truncf %147 : vector<1x80xf32> to vector<1x80xbf16>
    %c3_131 = arith.constant 3 : index
    %c0_132 = arith.constant 0 : index
    %c0_133 = arith.constant 0 : index
    %149 = vector.load %arg4[%c3_131, %c0_132, %c0_133] : memref<5x80x120xbf16, #tpu.memory_space<vmem>>, vector<1x80x120xbf16>
    %150 = vector.shape_cast %149 : vector<1x80x120xbf16> to vector<80x120xbf16>
    %cst_134 = arith.constant dense<0.000000e+00> : vector<1x120xf32>
    %151 = tpu.matmul %148, %150, %cst_134 {dimension_numbers = #tpu.dot_dimension_numbers<[1], [0], [0], [1], [0, 0, 1, 1], [], []>} : vector<1x80xbf16>, vector<80x120xbf16>, vector<1x120xf32> -> vector<1x120xf32>
    %152 = arith.addf %146, %151 : vector<1x120xf32>
    %c4_135 = arith.constant 4 : index
    %c0_136 = arith.constant 0 : index
    %153 = vector.load %arg14[%c4_135, %c0_136] : memref<5x80xf32, #tpu.memory_space<vmem>>, vector<1x80xf32>
    %154 = arith.truncf %153 : vector<1x80xf32> to vector<1x80xbf16>
    %c4_137 = arith.constant 4 : index
    %c0_138 = arith.constant 0 : index
    %c0_139 = arith.constant 0 : index
    %155 = vector.load %arg4[%c4_137, %c0_138, %c0_139] : memref<5x80x120xbf16, #tpu.memory_space<vmem>>, vector<1x80x120xbf16>
    %156 = vector.shape_cast %155 : vector<1x80x120xbf16> to vector<80x120xbf16>
    %cst_140 = arith.constant dense<0.000000e+00> : vector<1x120xf32>
    %157 = tpu.matmul %154, %156, %cst_140 {dimension_numbers = #tpu.dot_dimension_numbers<[1], [0], [0], [1], [0, 0, 1, 1], [], []>} : vector<1x80xbf16>, vector<80x120xbf16>, vector<1x120xf32> -> vector<1x120xf32>
    %158 = arith.addf %152, %157 : vector<1x120xf32>
    %cst_141 = arith.constant 0.000000e+00 : f32
    %159 = vector.broadcast %cst_141 : f32 to vector<1x120xf32>
    %160 = arith.maximumf %158, %159 : vector<1x120xf32>
    %cst_142 = arith.constant 1.220000e+02 : f32
    %161 = vector.broadcast %cst_142 : f32 to vector<1x120xf32>
    %162 = arith.mulf %161, %160 : vector<1x120xf32>
    %cst_143 = arith.constant 6.553600e+04 : f32
    %163 = vector.broadcast %cst_143 : f32 to vector<1x120xf32>
    %164 = arith.divf %162, %163 : vector<1x120xf32>
    %165 = math.floor %164 : vector<1x120xf32>
    %cst_144 = arith.constant -1.280000e+02 : f32
    %cst_145 = arith.constant 1.270000e+02 : f32
    %166 = vector.broadcast %cst_144 : f32 to vector<1x120xf32>
    %167 = arith.maximumf %166, %165 : vector<1x120xf32>
    %168 = vector.broadcast %cst_145 : f32 to vector<1x120xf32>
    %169 = arith.minimumf %168, %167 : vector<1x120xf32>
    %170 = arith.truncf %169 : vector<1x120xf32> to vector<1x120xbf16>
    %c0_146 = arith.constant 0 : index
    %c0_147 = arith.constant 0 : index
    %171 = vector.load %arg5[%c0_146, %c0_147] : memref<120x84xbf16, #tpu.memory_space<vmem>>, vector<120x84xbf16>
    %cst_148 = arith.constant dense<0.000000e+00> : vector<1x84xf32>
    %172 = tpu.matmul %170, %171, %cst_148 {dimension_numbers = #tpu.dot_dimension_numbers<[1], [0], [0], [1], [0, 0, 1, 1], [], []>} : vector<1x120xbf16>, vector<120x84xbf16>, vector<1x84xf32> -> vector<1x84xf32>
    %cst_149 = arith.constant 0.000000e+00 : f32
    %173 = vector.broadcast %cst_149 : f32 to vector<1x84xf32>
    %174 = arith.maximumf %172, %173 : vector<1x84xf32>
    %cst_150 = arith.constant 3.690000e+02 : f32
    %175 = vector.broadcast %cst_150 : f32 to vector<1x84xf32>
    %176 = arith.mulf %175, %174 : vector<1x84xf32>
    %cst_151 = arith.constant 6.553600e+04 : f32
    %177 = vector.broadcast %cst_151 : f32 to vector<1x84xf32>
    %178 = arith.divf %176, %177 : vector<1x84xf32>
    %179 = math.floor %178 : vector<1x84xf32>
    %cst_152 = arith.constant -1.280000e+02 : f32
    %cst_153 = arith.constant 1.270000e+02 : f32
    %180 = vector.broadcast %cst_152 : f32 to vector<1x84xf32>
    %181 = arith.maximumf %180, %179 : vector<1x84xf32>
    %182 = vector.broadcast %cst_153 : f32 to vector<1x84xf32>
    %183 = arith.minimumf %182, %181 : vector<1x84xf32>
    %184 = arith.truncf %183 : vector<1x84xf32> to vector<1x84xbf16>
    %c0_154 = arith.constant 0 : index
    %c0_155 = arith.constant 0 : index
    %185 = vector.load %arg6[%c0_154, %c0_155] : memref<84x128xbf16, #tpu.memory_space<vmem>>, vector<84x128xbf16>
    %cst_156 = arith.constant dense<0.000000e+00> : vector<1x128xf32>
    %186 = tpu.matmul %184, %185, %cst_156 {dimension_numbers = #tpu.dot_dimension_numbers<[1], [0], [0], [1], [0, 0, 1, 1], [], []>} : vector<1x84xbf16>, vector<84x128xbf16>, vector<1x128xf32> -> vector<1x128xf32>
    %cst_157 = arith.constant 3.860000e+02 : f32
    %187 = vector.broadcast %cst_157 : f32 to vector<1x128xf32>
    %188 = arith.mulf %187, %186 : vector<1x128xf32>
    %cst_158 = arith.constant 6.553600e+04 : f32
    %189 = vector.broadcast %cst_158 : f32 to vector<1x128xf32>
    %190 = arith.divf %188, %189 : vector<1x128xf32>
    %191 = math.floor %190 : vector<1x128xf32>
    %cst_159 = arith.constant -1.280000e+02 : f32
    %cst_160 = arith.constant 1.270000e+02 : f32
    %192 = vector.broadcast %cst_159 : f32 to vector<1x128xf32>
    %193 = arith.maximumf %192, %191 : vector<1x128xf32>
    %194 = vector.broadcast %cst_160 : f32 to vector<1x128xf32>
    %195 = arith.minimumf %194, %193 : vector<1x128xf32>
    %c0_161 = arith.constant 0 : index
    %c0_162 = arith.constant 0 : index
    %c0_163 = arith.constant 0 : index
    %196 = vector.load %arg11[%c0_161, %c0_162, %c0_163] : memref<1x1x128xf32, #tpu.memory_space<vmem>>, vector<1x1x128xf32>
    %197 = vector.shape_cast %196 : vector<1x1x128xf32> to vector<1x128xf32>
    %198 = vector.shape_cast %195 : vector<1x128xf32> to vector<1x1x128xf32>
    tpu.vector_store %arg11[%c0_161, %c0_162, %c0_163], %198 {strides = array<i32>} : memref<1x1x128xf32, #tpu.memory_space<vmem>>, vector<1x1x128xf32>,
    return
  }
  func.func @transform_0(%arg0: i32) -> (i32, i32, i32) {
    %c0_i32 = arith.constant 0 : i32
    %c0_i32_0 = arith.constant 0 : i32
    %c0_i32_1 = arith.constant 0 : i32
    return %arg0, %c0_i32, %c0_i32_0 : i32, i32, i32
  }
  func.func @transform_1(%arg0: i32) -> (i32, i32, i32) {
    %c0_i32 = arith.constant 0 : i32
    %c0_i32_0 = arith.constant 0 : i32
    %c0_i32_1 = arith.constant 0 : i32
    %c0_i32_2 = arith.constant 0 : i32
    return %c0_i32, %c0_i32_0, %c0_i32_1 : i32, i32, i32
  }
  func.func @transform_2(%arg0: i32) -> (i32, i32, i32) {
    %c0_i32 = arith.constant 0 : i32
    %c0_i32_0 = arith.constant 0 : i32
    %c0_i32_1 = arith.constant 0 : i32
    %c0_i32_2 = arith.constant 0 : i32
    return %c0_i32, %c0_i32_0, %c0_i32_1 : i32, i32, i32
  }
  func.func @transform_3(%arg0: i32) -> (i32, i32, i32) {
    %c0_i32 = arith.constant 0 : i32
    %c0_i32_0 = arith.constant 0 : i32
    %c0_i32_1 = arith.constant 0 : i32
    %c0_i32_2 = arith.constant 0 : i32
    return %c0_i32, %c0_i32_0, %c0_i32_1 : i32, i32, i32
  }
  func.func @transform_4(%arg0: i32) -> (i32, i32) {
    %c0_i32 = arith.constant 0 : i32
    %c0_i32_0 = arith.constant 0 : i32
    %c0_i32_1 = arith.constant 0 : i32
    return %c0_i32, %c0_i32_0 : i32, i32
  }
  func.func @transform_5(%arg0: i32) -> (i32, i32) {
    %c0_i32 = arith.constant 0 : i32
    %c0_i32_0 = arith.constant 0 : i32
    %c0_i32_1 = arith.constant 0 : i32
    return %c0_i32, %c0_i32_0 : i32, i32
  }
  func.func @transform_6(%arg0: i32) -> (i32, i32, i32) {
    %c0_i32 = arith.constant 0 : i32
    %c0_i32_0 = arith.constant 0 : i32
    %c0_i32_1 = arith.constant 0 : i32
    %c0_i32_2 = arith.constant 0 : i32
    return %c0_i32, %c0_i32_0, %c0_i32_1 : i32, i32, i32
  }
  func.func @transform_7(%arg0: i32) -> (i32, i32, i32) {
    %c0_i32 = arith.constant 0 : i32
    %c0_i32_0 = arith.constant 0 : i32
    %c0_i32_1 = arith.constant 0 : i32
    %c0_i32_2 = arith.constant 0 : i32
    return %c0_i32, %c0_i32_0, %c0_i32_1 : i32, i32, i32
  }
  func.func @transform_8(%arg0: i32) -> (i32, i32, i32) {
    %c0_i32 = arith.constant 0 : i32
    %c0_i32_0 = arith.constant 0 : i32
    %c0_i32_1 = arith.constant 0 : i32
    %c0_i32_2 = arith.constant 0 : i32
    return %c0_i32, %c0_i32_0, %c0_i32_1 : i32, i32, i32
  }
  func.func @transform_9(%arg0: i32) -> (i32, i32, i32) {
    %c0_i32 = arith.constant 0 : i32
    %c0_i32_0 = arith.constant 0 : i32
    %c0_i32_1 = arith.constant 0 : i32
    %c0_i32_2 = arith.constant 0 : i32
    return %c0_i32, %c0_i32_0, %c0_i32_1 : i32, i32, i32
  }
  func.func @transform_10(%arg0: i32) -> (i32, i32, i32) {
    %c0_i32 = arith.constant 0 : i32
    %c0_i32_0 = arith.constant 0 : i32
    %c0_i32_1 = arith.constant 0 : i32
    return %arg0, %c0_i32, %c0_i32_0 : i32, i32, i32
  }
}

</mosaic_0001>

<bundles_post_ra>
// kernel: tpu_custom_call.1
= control target key start
LH: loop header
LB: loop body
LE: loop exit
PB: predicated region body
PF: predicated region fallthrough
CT: control target
= control target key end

     0   :  { %15 = vsyncpa [#allocation6], 0  ;;  %s4685_s0 = inlined_call_operand.vmem [shape: f32[2,32,32], index: 0, kind: input, shape index: {}]   ;;  %s4686_s1 = inlined_call_operand.vmem [shape: bf16[5,32,168], index: 1, kind: input, shape index: {}]   ;;  %s4687_s2 = inlined_call_operand.vmem [shape: bf16[5,84,160], index: 2, kind: input, shape index: {}]   ;;  %s4688_s3 = inlined_call_operand.vmem [shape: bf16[5,80,120], index: 3, kind: input, shape index: {}]   ;;  %s4689_s4 = inlined_call_operand.vmem [shape: bf16[120,84], index: 4, kind: input, shape index: {}]   ;;  %s4690_s5 = inlined_call_operand.vmem [shape: bf16[84,128], index: 5, kind: input, shape index: {}]   ;;  %s4691_s6 = inlined_call_operand.vmem [shape: bf16[2,14,28], index: 6, kind: input, shape index: {}]   ;;  %s4692_s7 = inlined_call_operand.vmem [shape: bf16[2,168,84], index: 7, kind: input, shape index: {}]   ;;  %s4693_s8 = inlined_call_operand.vmem [shape: bf16[2,5,10], index: 8, kind: input, shape index: {}]   ;;  %s4694_s9 = inlined_call_operand.vmem [shape: bf16[2,160,80], index: 9, kind: input, shape index: {}]   ;;  %s4695_s10 = inlined_call_operand.hbm [shape: f32[2,1,128], index: 10, kind: output, shape index: {}]  }
   0x1   :  { %17 = vsyncpa [#allocation6 + $0x1], 0  ;;  %s3949_s13 = smov 0   ;;  %s3951_s14 = smov 0  }
   0x2   :  { %s3953_s15 = smov 0   ;;  %s3955_s16 = smov 0  }
   0x3 LB: > { %s3970_s17 = sadd.s32 4294967295, %s3888_s16   ;;  %s3014_s18 = sadd.s32 4294967294, %s3888_s16   ;;  %s3888_s16 = sphi %s3955_s16, %s4701_s16   ;;  %s3884_s15 = sphi %s3953_s15, %s4700_s15   ;;  %s3880_s14 = sphi %s3951_s14, %s4699_s14   ;;  %s3876_s13 = sphi %s3949_s13, %s4698_s13  }
   0x4   : > { %s3974_s19 = sadd.s32 1, %s3888_s16   ;;  %s245_s20 = sadd.s32 1, %s3884_s15 }
   0x5   : > { %s242_s21 = ssub.s32 %s3888_s16, %s3974_s19  ;;  %p255_p0 = scmp.ne.s32.totalorder %s3884_s15, %s3880_s14 }
   0x6   : > { %p243_p1 = scmp.eq.s32.totalorder %s242_s21, 0  ;;  %p256_p2 = scmp.eq.s32.totalorder %s3970_s17, 1 }
   0x7   : > { %p261_p3 = scmp.ne.s32.totalorder %s3880_s14, %s3876_s13  ;;  %p262_p4 = scmp.eq.s32.totalorder %s3014_s18, 1 }
   0x8   : > { %s3985_s22 = scalar_select %p243_p1, %s3884_s15, %s245_s20  }
   0x9   : > { %p3987_p5 = por %p256_p2, %p255_p0  ;;  %p3991_p6 = por %p262_p4, %p261_p3 }
   0xa   : > { %p3017_p7 = scmp.ge.s32.totalorder %s3888_s16, 1  ;;  %p315_p8 = scmp.lt.s32.totalorder %s3888_s16, 3 }
   0xc   : > { %p316_p9 = pnand %p3017_p7, %p315_p8 }
   0xd   : > { %v3628_v0 = vld [vmem:[%s4686_s1 + $0x4] ss:$8 sps:$4 sm:$0xff] (!%p316_p9)   ;;  %p352_p10 = scmp.lt.s32.totalorder (!%p316_p9), %s3970_s17, 1  ;;  %v3630_v1 = vld [vmem:[%s4686_s1] ss:$8 sps:$4 sm:$0xff] (!%p316_p9)   ;;  %v3890_v2 = vmov (!%p316_p9), 0  }
   0xe   : > { %319 = sbr.rel (%p316_p9) target bundleno = 2420 (0x974), region = 60  ;;  %541 = vmatprep.mubr.bf16.mxu0 (!%p316_p9), %v3890_v2  ;;  %462 = vmatprep.mubr.bf16.mxu1 (!%p316_p9), %v3890_v2  ;;  %v3631_v3 = vld [vmem:[%s4686_s1 + $0x14] ss:$8 sps:$4 sm:$0xff] (!%p316_p9)   ;;  %v3633_v4 = vld [vmem:[%s4686_s1 + $0x10] ss:$8 sps:$4 sm:$0xff] (!%p316_p9)   ;;  %vm378_vm0 = vcmask (!%p316_p9), 261120  }
   0xf   : > { %509 = vmatprep.subr.bf16.mxu0 (!%p316_p9), %v3628_v0  ;;  %v3636_v5 = vld [vmem:[%s4686_s1 + $0x44] ss:$8 sps:$4 sm:$0xff] (!%p316_p9)   ;;  %v3651_v25 = vld [vmem:[%s4686_s1 + $0x20] ss:$8 sps:$4 sm:$0xff] (!%p316_p9)   ;;  %v3652_v28 = vld [vmem:[%s4686_s1 + $0x34] ss:$8 sps:$4 sm:$0xff] (!%p316_p9)  }
  0x10   : > { %510 = vmatpush1.bf16.msra.mxu0 (!%p316_p9), %v3630_v1  ;;  %v3649_v22 = vld [vmem:[%s4686_s1 + $0x24] ss:$8 sps:$4 sm:$0xff] (!%p316_p9)   ;;  %v3654_v29 = vld [vmem:[%s4686_s1 + $0x30] ss:$8 sps:$4 sm:$0xff] (!%p316_p9)   ;;  %v3634_v32 = vld [vmem:[%s4686_s1 + $0x40] ss:$8 sps:$4 sm:$0xff] (!%p316_p9)  }
  0x11   : > { %511 = vmatprep.subr.bf16.mxu0 (!%p316_p9), %v3631_v3  ;;  %430 = vmatprep.subr.bf16.mxu1 (!%p316_p9), %v3649_v22  ;;  %v3639_v34 = vld [vmem:[%s4686_s1 + $0x54] ss:$8 sps:$4 sm:$0xff] (!%p316_p9)   ;;  %v3637_v36 = vld [vmem:[%s4686_s1 + $0x50] ss:$8 sps:$4 sm:$0xff] (!%p316_p9)   ;;  %v3642_v40 = vld [vmem:[%s4686_s1 + $0x64] ss:$8 sps:$4 sm:$0xff] (!%p316_p9)  }
  0x12   : > { %431 = vmatpush1.bf16.msra.mxu1 (!%p316_p9), %v3651_v25  ;;  %v3640_v48 = vld [vmem:[%s4686_s1 + $0x60] ss:$8 sps:$4 sm:$0xff] (!%p316_p9)   ;;  %v3645_v50 = vld [vmem:[%s4686_s1 + $0x74] ss:$8 sps:$4 sm:$0xff] (!%p316_p9)   ;;  %v3643_v53 = vld [vmem:[%s4686_s1 + $0x70] ss:$8 sps:$4 sm:$0xff] (!%p316_p9)  }
  0x13   : > { %432 = vmatprep.subr.bf16.mxu1 (!%p316_p9), %v3652_v28  ;;  %v3648_v54 = vld [vmem:[%s4686_s1 + $0x84] ss:$8 sps:$4 sm:$0xff] (!%p316_p9)   ;;  %v3646_v58 = vld [vmem:[%s4686_s1 + $0x80] ss:$8 sps:$4 sm:$0xff] (!%p316_p9)   ;;  %v3657_v60 = vld [vmem:[%s4686_s1 + $0x94] ss:$8 sps:$4 sm:$0xff] (!%p316_p9)  }
  0x14   : > { %512 = vmatpush1.bf16.msra.mxu0 (!%p316_p9), %v3633_v4  ;;  %v3655_v63 = vld [vmem:[%s4686_s1 + $0x90] ss:$8 sps:$4 sm:$0xff] (!%p316_p9)   ;;  %vm920_vm1 = vcmask (!%p316_p9), 1045504   ;;  %vm916_vm2 = vcmask (!%p316_p9), 228352   ;;  %vm1118_vm3 = vcmask (!%p316_p9), 1043456   ;;  %vm1114_vm4 = vcmask (!%p316_p9), 326656  }
  0x15   : > { %s353_s11 = scalar_select %p352_p10, %s3970_s17, 1  ;;  %599 = vmatprep.subr.bf16.mxu0 %v3636_v5  ;;  %vm1385_vm5 = vcmask 1041408   ;;  %vm1294_vm6 = vcmask 687104   ;;  %vm1296_vm7 = vcmask 685056   ;;  %vm1951_vm8 = vcmask 1044480  }
  0x16   : > { %433 = vmatpush1.bf16.msra.mxu1 %v3654_v29  ;;  %vm1947_vm9 = vcmask 80896   ;;  %vm3892_vm10 = vmmov 0   ;;  %vm2294_vm11 = vcmask 651264   ;;  %vm2351_vm12 = vcmask 654336   ;;  %s3366_s12 = sshll.u32 %s3970_s17, 4  ;;  %s3893_s17 = smov [#allocation5]  }
  0x17   : > { %s3369_s20 = sshll.u32 %s353_s11, 5  ;;  %vm2796_vm13 = vcmask 982016   ;;  %s350_s11 = sand.u32 1, %s3880_s14  }
  0x18   : > { %s356_s28 = scalar_lea.vmem %s4685_s0, %s3369_s20  ;;  %s351_s18 = scalar_lea.vmem [#allocation5], %s350_s11 }
  0x19   : > { %v358_v6 = vld [vmem:[%s356_s28] sm:$0xff]  ;;  %v359_v7 = vld [vmem:[%s356_s28 + $0x8] sm:$0xff]  ;;  %v360_v8 = vld [vmem:[%s356_s28 + $0x10] sm:$0xff]  ;;  %s2959_s20 = sshll.u32 %s351_s18, 4  ;;  %s4643_s26 = scalar_lea.hbm %s4695_s10, %s3366_s12  ;;  %s4645_s20 = int_to_ptr.vmem [resolvable:$true] %s2959_s20 }
  0x1a   : > { %v362_v9 = vmul.f32 127.55699, %v358_v6  ;;  %v363_v10 = vmul.f32 127.55699, %v359_v7  ;;  %v361_v11 = vld [vmem:[%s356_s28 + $0x18] sm:$0xff]  ;;  %s2947_s27 = scalar_lea.sflag [#allocation6], %s350_s11 }
  0x1b   : > { %v364_v12 = vmul.f32 127.55699, %v360_v8  ;;  %v365_v13 = vmul.f32 127.55699, %v361_v11  ;;  %s3826_s28 = scalar_lea.vmem %s4645_s20, 16  ;;  %s3830_s29 = sshll.u32 %s3893_s17, 4  ;;  %s3831_s29 = int_to_ptr.vmem [resolvable:$false] %s3830_s29 }
  0x1c   : > { %v366_v14 = vfloor.f32 %v362_v9  ;;  %v367_v15 = vfloor.f32 %v363_v10  ;;  %p3827_p11 = scmp.ne.s32.totalorder %s4645_s20, %s3826_s28  ;;  %s3832_s30 = scalar_lea.vmem %s3831_s29, 32 }
  0x1d   : > { %v368_v16 = vfloor.f32 %v364_v12  ;;  %v369_v17 = vfloor.f32 %v365_v13  ;;  %p3833_p0 = scmp.lt.s32.totalorder %s4645_s20, %s3831_s29  ;;  %p3834_p1 = scmp.lt.s32.totalorder %s3832_s30, %s3826_s28 }
  0x1e   : > { %v370_v18 = vmax.f32 %v366_v14, -128.0  ;;  %v371_v19 = vmax.f32 %v367_v15, -128.0  ;;  %p3828_p12 = pnand %p3827_p11, %p3987_p5 }
  0x1f   : > { %v372_v20 = vmax.f32 %v368_v16, -128.0  ;;  %v373_v21 = vmax.f32 %v369_v17, -128.0  ;;  %p3835_p2 = por %p3834_p1, %p3833_p0 }
  0x20   : > { %v374_v23 = vmin.f32 %v370_v18, 127.0  ;;  %v375_v24 = vmin.f32 %v371_v19, 127.0  ;;  %p3829_p13 = pneg %p3828_p12 }
  0x21   : > { %v376_v26 = vmin.f32 %v372_v20, 127.0  ;;  %v377_v27 = vmin.f32 %v373_v21, 127.0 }
  0x22   : > { %379 = vst.msk [vmem:[#allocation2] sm:$0xff] %vm378_vm0, %v374_v23  ;;  %380 = vst.msk [vmem:[#allocation2 + $0x8] sm:$0xff] %vm378_vm0, %v375_v24  ;;  %p3836_p3 = pnand %p3835_p2, %p3829_p13 }
  0x23   : > { %381 = vst.msk [vmem:[#allocation2 + $0x10] sm:$0xff] %vm378_vm0, %v376_v26  ;;  %382 = vst.msk [vmem:[#allocation2 + $0x18] sm:$0xff] %vm378_vm0, %v377_v27 }
  0x29   : > { %v383_v30 = vld [vmem:[#allocation2] sm:$0xff]  ;;  %v384_v31 = vld [vmem:[#allocation2 + $0x8] sm:$0xff] }
  0x2a   : > { %v387_v33 = vpack.c.bf16 %v384_v31, %v383_v30  ;;  %v385_v35 = vld [vmem:[#allocation2 + $0x10] sm:$0xff]  ;;  %v386_v37 = vld [vmem:[#allocation2 + $0x18] sm:$0xf]  ;;  %v393_v38 = vld [vmem:[#allocation2 + $0x1] sm:$0xff] }
  0x2b   : > { %v394_v39 = vld [vmem:[#allocation2 + $0x9] sm:$0xff]  ;;  %v395_v42 = vld [vmem:[#allocation2 + $0x11] sm:$0xff]  ;;  %v396_v43 = vld [vmem:[#allocation2 + $0x19] sm:$0xf]  ;;  %v388_v44 = vpack.c.bf16 %v386_v37, %v385_v35 }
  0x2c   : > { %3034 = vmatmul.mubr.msk.bf16.vlgmr.msra.gmra.mrb[0].mxu0 %vm378_vm0, %v387_v33  ;;  %v397_v41 = vpack.c.bf16 %v394_v39, %v393_v38  ;;  %v562_v45 = vld [vmem:[#allocation2 + $0x2] sm:$0xff]  ;;  %v563_v46 = vld [vmem:[#allocation2 + $0xa] sm:$0xff]  ;;  %v398_v47 = vpack.c.bf16 %v396_v43, %v395_v42  ;;  %v564_v51 = vld [vmem:[#allocation2 + $0x12] sm:$0xff] }
  0x2d   : > { %600 = vmatpush1.bf16.msra.mxu0 %v3634_v32  ;;  %551 = vmatprep.mubr.bf16.mxu0 %v3890_v2  ;;  %v566_v49 = vpack.c.bf16 %v563_v46, %v562_v45  ;;  %v565_v52 = vld [vmem:[#allocation2 + $0x1a] sm:$0xf]  ;;  %v660_v56 = vld [vmem:[#allocation2 + $0x3] sm:$0xff]  ;;  %v661_v57 = vld [vmem:[#allocation2 + $0xb] sm:$0xff] }
  0x2e   : > { %601 = vmatprep.subr.bf16.mxu0 %v3639_v34  ;;  %3028 = vmatmul.mubr.msk.bf16.vlgmr.msra.gmra.mrb[0].mxu1 %vm378_vm0, %v397_v41  ;;  %v567_v55 = vpack.c.bf16 %v565_v52, %v564_v51  ;;  %v664_v59 = vpack.c.bf16 %v661_v57, %v660_v56  ;;  %v662_v61 = vld [vmem:[#allocation2 + $0x13] sm:$0xff]  ;;  %v663_v62 = vld [vmem:[#allocation2 + $0x1b] sm:$0xf]  ;;  %v758_v1 = vld [vmem:[#allocation2 + $0x4] sm:$0xff] }
  0x2f   : > { %472 = vmatprep.mubr.bf16.mxu1 %v3890_v2  ;;  %v665_v0 = vpack.c.bf16 %v663_v62, %v662_v61  ;;  %v759_v3 = vld [vmem:[#allocation2 + $0xc] sm:$0xff]  ;;  %v760_v5 = vld [vmem:[#allocation2 + $0x14] sm:$0xff]  ;;  %v761_v6 = vld [vmem:[#allocation2 + $0x1c] sm:$0xf] }
  0x30   : > { %v762_v4 = vpack.c.bf16 %v759_v3, %v758_v1  ;;  %v763_v7 = vpack.c.bf16 %v761_v6, %v760_v5 }
  0x31   : > { %602 = vmatpush1.bf16.msra.mxu0 %v3637_v36 }
  0x32   : > { %697 = vmatprep.subr.bf16.mxu0 %v3642_v40 }
  0x34   : > { %3035 = vmatmul.mubr.msk.bf16.gmra.mrb[4].mxu0 %vm378_vm0, %v388_v44 }
  0x35   : > { %631 = vmatprep.mubr.bf16.mxu0 %v3890_v2 }
  0x36   : > { %3029 = vmatmul.mubr.msk.bf16.gmra.mrb[4].mxu1 %vm378_vm0, %v398_v47 }
  0x37   : > { %959 = vmatprep.mubr.bf16.mxu1 %v3890_v2 }
  0x3c   : > { %3044 = vmatmul.mubr.msk.bf16.vlgmr.msra.gmra.mrb[0].mxu0 %vm378_vm0, %v566_v49 }
  0x3d   : > { %698 = vmatpush1.bf16.msra.mxu0 %v3640_v48  ;;  %641 = vmatprep.mubr.bf16.mxu0 %v3890_v2 }
  0x3e   : > { %699 = vmatprep.subr.bf16.mxu0 %v3645_v50 }
  0x41   : > { %700 = vmatpush1.bf16.msra.mxu0 %v3643_v53 }
  0x42   : > { %795 = vmatprep.subr.bf16.mxu0 %v3648_v54 }
  0x44   : > { %3045 = vmatmul.mubr.msk.bf16.gmra.mrb[4].mxu0 %vm378_vm0, %v567_v55 }
  0x45   : > { %729 = vmatprep.mubr.bf16.mxu0 %v3890_v2 }
  0x4c   : > { %3054 = vmatmul.mubr.msk.bf16.vlgmr.msra.gmra.mrb[0].mxu0 %vm378_vm0, %v664_v59 }
  0x4d   : > { %796 = vmatpush1.bf16.msra.mxu0 %v3646_v58  ;;  %739 = vmatprep.mubr.bf16.mxu0 %v3890_v2 }
  0x4e   : > { %797 = vmatprep.subr.bf16.mxu0 %v3657_v60 }
  0x51   : > { %798 = vmatpush1.bf16.msra.mxu0 %v3655_v63 }
  0x54   : > { %3055 = vmatmul.mubr.msk.bf16.gmra.mrb[4].mxu0 %vm378_vm0, %v665_v0 }
  0x55   : > { %827 = vmatprep.mubr.bf16.mxu0 %v3890_v2 }
  0x5c   : > { %3064 = vmatmul.mubr.msk.bf16.vlgmr.msra.gmra.mrb[0].mxu0 %vm378_vm0, %v762_v4 }
  0x5d   : > { %837 = vmatprep.mubr.bf16.mxu0 %v3890_v2 }
  0x64   : > { %3065 = vmatmul.mubr.msk.bf16.gmra.mrb[4].mxu0 %vm378_vm0, %v763_v7 }
  0x65   : > { %1424 = vmatprep.mubr.bf16.mxu0 %v3890_v2 }
 0x101   : > { %v464_v8 = vpop.f32.mrb[0].mxu1 }
 0x102   : > { %v466_v9 = vpop.f32.mrb[1].mxu1 }
 0x103   : > { %v468_v10 = vpop.f32.mrb[2].mxu1 }
 0x104   : > { %v470_v11 = vpop.f32.mrb[3].mxu1 }
 0x109   : > { %v474_v12 = vpop.f32.mrb[4].mxu1 }
 0x10a   : > { %v476_v13 = vpop.f32.mrb[5].mxu1 }
 0x10b   : > { %v478_v14 = vpop.f32.mrb[6].mxu1 }
 0x10c   : > { %v480_v15 = vpop.f32.mrb[7].mxu1 }
 0x12f   : > { %v829_v16 = vpop.f32.mrb[0].mxu0 }
 0x130   : > { %v3522_v17 = vadd.f32 %v829_v16, %v464_v8  ;;  %v831_v18 = vpop.f32.mrb[1].mxu0 }
 0x131   : > { %v3523_v19 = vadd.f32 %v831_v18, %v466_v9  ;;  %v833_v20 = vpop.f32.mrb[2].mxu0 }
 0x132   : > { %v856_v21 = vmax.f32 %v3522_v17, 0.0  ;;  %v3524_v22 = vadd.f32 %v833_v20, %v468_v10  ;;  %v835_v23 = vpop.f32.mrb[3].mxu0 }
 0x133   : > { %v857_v24 = vmax.f32 %v3523_v19, 0.0  ;;  %v3525_v25 = vadd.f32 %v835_v23, %v470_v11  ;;  %v3659_v23 = vld [vmem:[%s4691_s6 + $0x8] sm:$0x7f]  }
 0x134   : > { %v864_v26 = vmul.f32 177.0, %v856_v21  ;;  %v858_v27 = vmax.f32 %v3524_v22, 0.0  ;;  %v3658_v22 = vld [vmem:[%s4691_s6] sm:$0x7f]  }
 0x135   : > { %v865_v28 = vmul.f32 177.0, %v857_v24  ;;  %v859_v29 = vmax.f32 %v3525_v25, 0.0  ;;  %v3660_v24 = vld [vmem:[%s4692_s7] sm:$0xff]   ;;  %v3661_v25 = vld [vmem:[%s4692_s7 + $0x8] sm:$0xff]  }
 0x136   : > { %v873_v30 = vmul.f32 1.5258789e-05, %v864_v26  ;;  %v866_v31 = vmul.f32 177.0, %v858_v27  ;;  %v3662_v26 = vld [vmem:[%s4692_s7 + $0x10] sm:$0xff]   ;;  %v3663_v27 = vld [vmem:[%s4692_s7 + $0x18] sm:$0xff]  }
 0x137   : > { %v874_v32 = vmul.f32 1.5258789e-05, %v865_v28  ;;  %v867_v33 = vmul.f32 177.0, %v859_v29  ;;  %v839_v34 = vpop.f32.mrb[4].mxu0  ;;  %v3664_v28 = vld [vmem:[%s4692_s7 + $0x20] sm:$0xff]   ;;  %v3665_v29 = vld [vmem:[%s4692_s7 + $0x28] sm:$0xff]  }
 0x138   : > { %v881_v35 = vfloor.f32 %v873_v30  ;;  %v875_v36 = vmul.f32 1.5258789e-05, %v866_v31  ;;  %v3526_v37 = vadd.f32 %v839_v34, %v474_v12  ;;  %v841_v38 = vpop.f32.mrb[5].mxu0  ;;  %v3666_v30 = vld [vmem:[%s4692_s7 + $0x30] sm:$0xff]   ;;  %v3667_v31 = vld [vmem:[%s4692_s7 + $0x38] sm:$0xff]  }
 0x139   : > { %v882_v39 = vfloor.f32 %v874_v32  ;;  %v876_v40 = vmul.f32 1.5258789e-05, %v867_v33  ;;  %v3527_v41 = vadd.f32 %v841_v38, %v476_v13  ;;  %v843_v42 = vpop.f32.mrb[6].mxu0  ;;  %v3668_v32 = vld [vmem:[%s4692_s7 + $0x40] sm:$0xff]   ;;  %v3669_v33 = vld [vmem:[%s4692_s7 + $0x48] sm:$0xff]   ;;  %v3670_v34 = vld [vmem:[%s4692_s7 + $0x50] ss:$0 sps:$4 sm:$0xff]  }
 0x13a   : > { %v889_v43 = vmax.f32 %v881_v35, -128.0  ;;  %v883_v44 = vfloor.f32 %v875_v36  ;;  %v860_v45 = vmax.f32 %v3526_v37, 0.0  ;;  %v3528_v46 = vadd.f32 %v843_v42, %v478_v14  ;;  %v845_v47 = vpop.f32.mrb[7].mxu0 }
 0x13b   : > { %v890_v48 = vmax.f32 %v882_v39, -128.0  ;;  %v884_v49 = vfloor.f32 %v876_v40  ;;  %v861_v50 = vmax.f32 %v3527_v41, 0.0  ;;  %v3529_v51 = vadd.f32 %v845_v47, %v480_v15 }
 0x13c   : > { %v891_v52 = vmax.f32 %v883_v44, -128.0  ;;  %v868_v53 = vmul.f32 177.0, %v860_v45  ;;  %v862_v54 = vmax.f32 %v3528_v46, 0.0  ;;  %v897_v58 = vmin.f32 %v889_v43, 127.0 }
 0x13d   : > { %v892_v55 = vmax.f32 %v884_v49, -128.0  ;;  %v869_v56 = vmul.f32 177.0, %v861_v50  ;;  %v863_v57 = vmax.f32 %v3529_v51, 0.0  ;;  %v898_v62 = vmin.f32 %v890_v48, 127.0  ;;  %v3671_v50 = vld [vmem:[%s4692_s7 + $0x54] sm:$0xff]   ;;  %v3672_v51 = vld [vmem:[%s4692_s7 + $0x5c] sm:$0xff]  }
 0x13e   : > { %v899_v59 = vmin.f32 %v891_v52, 127.0  ;;  %v877_v60 = vmul.f32 1.5258789e-05, %v868_v53  ;;  %v870_v61 = vmul.f32 177.0, %v862_v54  ;;  %v1120_v35 = vsel %vm1118_vm3, %v3670_v34, 0  ;;  %v3673_v52 = vld [vmem:[%s4692_s7 + $0x64] sm:$0xff]   ;;  %v3674_v53 = vld [vmem:[%s4692_s7 + $0x6c] sm:$0xff]  }
 0x13f   : > { %v900_v63 = vmin.f32 %v892_v55, 127.0  ;;  %v878_v0 = vmul.f32 1.5258789e-05, %v869_v56  ;;  %v871_v1 = vmul.f32 177.0, %v863_v57  ;;  %v3675_v54 = vld [vmem:[%s4692_s7 + $0x74] sm:$0xff]   ;;  %v3676_v55 = vld [vmem:[%s4692_s7 + $0x7c] sm:$0xff]   ;;  %v3677_v56 = vld [vmem:[%s4692_s7 + $0x84] sm:$0xff]  }
 0x140   : > { %v905_v3 = vpack.c.bf16 %v899_v59, %v897_v58  ;;  %v885_v4 = vfloor.f32 %v877_v60  ;;  %v879_v5 = vmul.f32 1.5258789e-05, %v870_v61  ;;  %v3678_v57 = vld [vmem:[%s4692_s7 + $0x8c] sm:$0xff]   ;;  %v3679_v58 = vld [vmem:[%s4692_s7 + $0x94] sm:$0xff]   ;;  %v3680_v59 = vld [vmem:[%s4692_s7 + $0x9c] sm:$0xff]  }
 0x141   : > { %v886_v6 = vfloor.f32 %v878_v0  ;;  %v880_v7 = vmul.f32 1.5258789e-05, %v871_v1  ;;  %v906_v8 = vpack.c.bf16 %v900_v63, %v898_v62  ;;  %v3681_v60 = vld [vmem:[%s4692_s7 + $0xa4] ss:$0 sps:$4 sm:$0xff]   ;;  %v3682_v62 = vld [vmem:[%s4687_s2 + $0x58] ss:$8 sps:$4 sm:$0xff]  }
 0x142   : > { %v893_v9 = vmax.f32 %v885_v4, -128.0  ;;  %v887_v10 = vfloor.f32 %v879_v5  ;;  %v1249_v61 = vsel %vm1118_vm3, %v3681_v60, 0  ;;  %v3684_v63 = vld [vmem:[%s4687_s2 + $0x5c] ss:$8 sps:$4 sm:$0xff]   ;;  %v3687_v0 = vld [vmem:[%s4687_s2 + $0x6c] ss:$8 sps:$4 sm:$0xff]  }
 0x143   : > { %v894_v11 = vmax.f32 %v886_v6, -128.0  ;;  %v888_v12 = vfloor.f32 %v880_v7  ;;  %927 = vmatprep.subr.bf16.mxu1 %v906_v8  ;;  %1392 = vmatprep.subr.bf16.mxu0 %v3684_v63  ;;  %v3685_v1 = vld [vmem:[%s4687_s2 + $0x68] ss:$8 sps:$4 sm:$0xff]   ;;  %v3688_v4 = vld [vmem:[%s4687_s2 + $0x78] ss:$8 sps:$4 sm:$0xff]  }
 0x144   : > { %v895_v13 = vmax.f32 %v887_v10, -128.0  ;;  %928 = vmatpush1.bf16.msra.mxu1 %v905_v3  ;;  %v901_v15 = vmin.f32 %v893_v9, 127.0  ;;  %1393 = vmatpush1.bf16.msra.mxu0 %v3682_v62  ;;  %v3693_v5 = vld [vmem:[%s4687_s2 + $0x8c] ss:$8 sps:$4 sm:$0xff]   ;;  %v3691_v6 = vld [vmem:[%s4687_s2 + $0x88] ss:$8 sps:$4 sm:$0xff]  }
 0x145   : > { %v896_v14 = vmax.f32 %v888_v12, -128.0  ;;  %v902_v17 = vmin.f32 %v894_v11, 127.0  ;;  %1394 = vmatprep.subr.bf16.mxu0 %v3687_v0  ;;  %v3696_v7 = vld [vmem:[%s4687_s2 + $0x9c] ss:$8 sps:$4 sm:$0xff]   ;;  %v3129_v9 = vld [vmem:[%s4687_s2 + $0xa8] sm:$0x33] }
 0x146   : > { %v903_v16 = vmin.f32 %v895_v13, 127.0  ;;  %v3141_v10 = vcombine.high %v3129_v9, %v3129_v9  ;;  %v3140_v11 = vcombine.low %v3129_v9, %v3129_v9  ;;  %v3701_v13 = vld [vmem:[%s4687_s2 + $0x4] ss:$8 sps:$4 sm:$0xff]   ;;  %v3733_v60 = vld [vmem:[%s4687_s2 + $0x108] ss:$8 sps:$4 sm:$0xff]  }
 0x147   : > { %v904_v18 = vmin.f32 %v896_v14, 127.0  ;;  %v3713_v34 = vld [vmem:[%s4687_s2 + $0x44] ss:$8 sps:$4 sm:$0xff]   ;;  %v3736_v63 = vld [vmem:[%s4687_s2 + $0x118] ss:$8 sps:$4 sm:$0xff]  }
 0x148   : > { %v907_v19 = vpack.c.bf16 %v903_v16, %v901_v15  ;;  %1395 = vmatpush1.bf16.msra.mxu0 %v3685_v1  ;;  %v1387_v12 = vsel %vm1385_vm5, %v3140_v11, 0  ;;  %v3738_v62 = vld [vmem:[%s4687_s2 + $0x11c] ss:$8 sps:$4 sm:$0xff]   ;;  %v3741_v0 = vld [vmem:[%s4687_s2 + $0x12c] ss:$8 sps:$4 sm:$0xff]  }
 0x149   : > { %v908_v20 = vpack.c.bf16 %v904_v18, %v902_v17  ;;  %v3739_v1 = vld [vmem:[%s4687_s2 + $0x128] ss:$8 sps:$4 sm:$0xff]   ;;  %v3752_v11 = vld [vmem:[%s4687_s2 + $0x164] ss:$8 sps:$4 sm:$0xff]  }
 0x14a   : > { %v922_v21 = vsel %vm920_vm1, %v907_v19, 0 }
 0x14b   : > { %3067 = vmatprep.subr.msk.bf16.mxu1 %vm920_vm1, %v908_v20 }
 0x14c   : > { %930 = vmatpush1.bf16.msra.mxu1 %v922_v21 }
 0x14d   : > { %981 = vmatprep.subr.bf16.mxu1 %v906_v8  ;;  %v3694_v8 = vld [vmem:[%s4687_s2 + $0x98] ss:$8 sps:$4 sm:$0xff]  }
 0x14f   : > { %3068 = vmatmul.mubr.msk.bf16.vlgmr.msra.gmra.mrb[8].mxu1 %vm916_vm2, %v3658_v22 }
 0x150   : > { %982 = vmatpush1.bf16.msra.mxu1 %v905_v3  ;;  %1013 = vmatprep.mubr.bf16.mxu1 %v3890_v2  ;;  %v3690_v3 = vld [vmem:[%s4687_s2 + $0x7c] ss:$8 sps:$4 sm:$0xff]  }
 0x151   : > { %3072 = vmatprep.subr.msk.bf16.mxu1 %vm920_vm1, %v908_v20  ;;  %1396 = vmatprep.subr.bf16.mxu0 %v3690_v3  ;;  %v3744_v3 = vld [vmem:[%s4687_s2 + $0x13c] ss:$8 sps:$4 sm:$0xff]  }
 0x152   : > { %1397 = vmatpush1.bf16.msra.mxu0 %v3688_v4  ;;  %v3742_v4 = vld [vmem:[%s4687_s2 + $0x138] ss:$8 sps:$4 sm:$0xff]  }
 0x153   : > { %1398 = vmatprep.subr.bf16.mxu0 %v3693_v5  ;;  %v3747_v5 = vld [vmem:[%s4687_s2 + $0x14c] ss:$8 sps:$4 sm:$0xff]  }
 0x154   : > { %984 = vmatpush1.bf16.msra.mxu1 %v922_v21 }
 0x155   : > { %1122 = vmatprep.subr.bf16.mxu1 %v3890_v2 }
 0x156   : > { %1399 = vmatpush1.bf16.msra.mxu0 %v3691_v6  ;;  %v3193_v6 = vld [vmem:[%s4687_s2 + $0x158] sm:$0x33] }
 0x157   : > { %3073 = vmatmul.mubr.msk.bf16.vlgmr.msra.gmra.mrb[12].mxu1 %vm916_vm2, %v3659_v23  ;;  %1400 = vmatprep.subr.bf16.mxu0 %v3696_v7  ;;  %v3745_v7 = vld [vmem:[%s4687_s2 + $0x148] ss:$8 sps:$4 sm:$0xff]   ;;  %v3204_v9 = vcombine.low %v3193_v6, %v3193_v6 }
 0x158   : > { %1123 = vmatpush1.bf16.msra.mxu1 %v3660_v24  ;;  %v3699_v24 = vld [vmem:[%s4687_s2] ss:$8 sps:$4 sm:$0xff]  }
 0x159   : > { %1124 = vmatprep.subr.bf16.mxu1 %v3890_v2 }
 0x15a   : > { %1401 = vmatpush1.bf16.msra.mxu0 %v3694_v8  ;;  %v3205_v8 = vcombine.high %v3193_v6, %v3193_v6  ;;  %v3772_v6 = vld [vmem:[%s4694_s9 + $0x28] sm:$0xff]  }
 0x15b   : > { %3142 = vmatprep.subr.msk.bf16.mxu0 %vm1385_vm5, %v3141_v10  ;;  %v1742_v10 = vsel %vm1385_vm5, %v3204_v9, 0  ;;  %v3775_v9 = vld [vmem:[%s4694_s9 + $0x40] sm:$0xff]  }
 0x15c   : > { %1125 = vmatpush1.bf16.msra.mxu1 %v3661_v25 }
 0x15d   : > { %1126 = vmatprep.subr.bf16.mxu1 %v3890_v2 }
 0x15e   : > { %1403 = vmatpush1.bf16.msra.mxu0 %v1387_v12 }
 0x15f   : > { %1499 = vmatprep.subr.bf16.mxu0 %v3701_v13 }
 0x160   : > { %1127 = vmatpush1.bf16.msra.mxu1 %v3662_v26 }
 0x161   : > { %1128 = vmatprep.subr.bf16.mxu1 %v3890_v2 }
 0x164   : > { %1129 = vmatpush1.bf16.msra.mxu1 %v3663_v27 }
 0x165   : > { %1130 = vmatprep.subr.bf16.mxu1 %v3890_v2 }
 0x168   : > { %1131 = vmatpush1.bf16.msra.mxu1 %v3664_v28  ;;  %v3704_v28 = vld [vmem:[%s4687_s2 + $0x14] ss:$8 sps:$4 sm:$0xff]  }
 0x169   : > { %1132 = vmatprep.subr.bf16.mxu1 %v3890_v2 }
 0x16c   : > { %1133 = vmatpush1.bf16.msra.mxu1 %v3665_v29  ;;  %v3702_v29 = vld [vmem:[%s4687_s2 + $0x10] ss:$8 sps:$4 sm:$0xff]  }
 0x16d   : > { %1134 = vmatprep.subr.bf16.mxu1 %v3890_v2 }
 0x170   : > { %1135 = vmatpush1.bf16.msra.mxu1 %v3666_v30  ;;  %v3707_v30 = vld [vmem:[%s4687_s2 + $0x24] ss:$8 sps:$4 sm:$0xff]  }
 0x171   : > { %1136 = vmatprep.subr.bf16.mxu1 %v3890_v2 }
 0x174   : > { %1137 = vmatpush1.bf16.msra.mxu1 %v3667_v31  ;;  %v3705_v31 = vld [vmem:[%s4687_s2 + $0x20] ss:$8 sps:$4 sm:$0xff]  }
 0x175   : > { %1138 = vmatprep.subr.bf16.mxu1 %v3890_v2 }
 0x178   : > { %1139 = vmatpush1.bf16.msra.mxu1 %v3668_v32  ;;  %v3710_v32 = vld [vmem:[%s4687_s2 + $0x34] ss:$8 sps:$4 sm:$0xff]  }
 0x179   : > { %1140 = vmatprep.subr.bf16.mxu1 %v3890_v2 }
 0x17c   : > { %1141 = vmatpush1.bf16.msra.mxu1 %v3669_v33  ;;  %v3708_v33 = vld [vmem:[%s4687_s2 + $0x30] ss:$8 sps:$4 sm:$0xff]  }
 0x17d   : > { %1142 = vmatprep.subr.bf16.mxu1 %v3890_v2 }
 0x180   : > { %1143 = vmatpush1.bf16.msra.mxu1 %v1120_v35  ;;  %v1311_v35 = vld [vmem:[%s4687_s2 + $0x50] sm:$0x33] }
 0x181   : > { %1251 = vmatprep.subr.bf16.mxu1 %v3890_v2 }
 0x222   : > { %v961_v36 = vpop.f32.mrb[8].mxu1 }
 0x223   : > { %v963_v37 = vpop.f32.mrb[9].mxu1 }
 0x224   : > { %v965_v38 = vpop.f32.mrb[10].mxu1 }
 0x225   : > { %v967_v39 = vpop.f32.mrb[11].mxu1 }
 0x22a   : > { %v1015_v40 = vpop.f32.mrb[12].mxu1 }
 0x22b   : > { %v1024_v41 = vmax.f32 %v961_v36, %v1015_v40  ;;  %v1017_v42 = vpop.f32.mrb[13].mxu1  ;;  %v3711_v36 = vld [vmem:[%s4687_s2 + $0x40] ss:$8 sps:$4 sm:$0xff]   ;;  %v3718_v40 = vld [vmem:[%s4687_s2 + $0xb4] ss:$8 sps:$4 sm:$0xff]  }
 0x22c   : > { %v1025_v43 = vmax.f32 %v963_v37, %v1017_v42  ;;  %v1019_v44 = vpop.f32.mrb[14].mxu1  ;;  %v3155_v37 = vcombine.high %v1311_v35, %v1311_v35 }
 0x22d   : > { %v1026_v45 = vmax.f32 %v965_v38, %v1019_v44  ;;  %v1021_v46 = vpop.f32.mrb[15].mxu1  ;;  %v3154_v38 = vcombine.low %v1311_v35, %v1311_v35 }
 0x22e   : > { %v1027_v47 = vmax.f32 %v967_v39, %v1021_v46  ;;  %v3719_v46 = vld [vmem:[%s4687_s2 + $0xc0] ss:$8 sps:$4 sm:$0xff]  }
 0x22f   : > { %v1028_v48 = vpack.c.bf16 %v1026_v45, %v1024_v41  ;;  %v1494_v39 = vsel %vm1385_vm5, %v3154_v38, 0  ;;  %v3721_v45 = vld [vmem:[%s4687_s2 + $0xc4] ss:$8 sps:$4 sm:$0xff]  }
 0x230   : > { %v1029_v49 = vpack.c.bf16 %v1027_v47, %v1025_v43  ;;  %v3716_v43 = vld [vmem:[%s4687_s2 + $0xb0] ss:$8 sps:$4 sm:$0xff]   ;;  %v3724_v47 = vld [vmem:[%s4687_s2 + $0xd4] ss:$8 sps:$4 sm:$0xff]  }
 0x232   : > { %3085 = vmatprep.mubr.msk.bf16.mxu1 %vm1114_vm4, %v1029_v49 }
 0x233   : > { %1155 = vmatmul.mubr.bf16.vlgmr.msra.gmra.mrb[16].mxu1 %v1028_v48 }
 0x234   : > { %1252 = vmatpush1.bf16.msra.mxu1 %v3671_v50  ;;  %3118 = vmatprep.mubr.msk.bf16.mxu1 %vm1114_vm4, %v1029_v49  ;;  %v3727_v49 = vld [vmem:[%s4687_s2 + $0xe4] ss:$8 sps:$4 sm:$0xff]   ;;  %v3725_v50 = vld [vmem:[%s4687_s2 + $0xe0] ss:$8 sps:$4 sm:$0xff]  }
 0x235   : > { %1253 = vmatprep.subr.bf16.mxu1 %v3890_v2 }
 0x238   : > { %1254 = vmatpush1.bf16.msra.mxu1 %v3672_v51  ;;  %v3730_v51 = vld [vmem:[%s4687_s2 + $0xf4] ss:$8 sps:$4 sm:$0xff]  }
 0x239   : > { %1255 = vmatprep.subr.bf16.mxu1 %v3890_v2 }
 0x23c   : > { %1256 = vmatpush1.bf16.msra.mxu1 %v3673_v52  ;;  %v3168_v52 = vld [vmem:[%s4687_s2 + $0x100] sm:$0x33] }
 0x23d   : > { %1257 = vmatprep.subr.bf16.mxu1 %v3890_v2 }
 0x240   : > { %1258 = vmatpush1.bf16.msra.mxu1 %v3674_v53  ;;  %v3728_v53 = vld [vmem:[%s4687_s2 + $0xf0] ss:$8 sps:$4 sm:$0xff]  }
 0x241   : > { %1259 = vmatprep.subr.bf16.mxu1 %v3890_v2 }
 0x244   : > { %1260 = vmatpush1.bf16.msra.mxu1 %v3675_v54  ;;  %v3180_v54 = vcombine.high %v3168_v52, %v3168_v52 }
 0x245   : > { %1261 = vmatprep.subr.bf16.mxu1 %v3890_v2 }
 0x248   : > { %1262 = vmatpush1.bf16.msra.mxu1 %v3676_v55  ;;  %v3179_v55 = vcombine.low %v3168_v52, %v3168_v52 }
 0x249   : > { %1263 = vmatprep.subr.bf16.mxu1 %v3890_v2 }
 0x24c   : > { %1264 = vmatpush1.bf16.msra.mxu1 %v3677_v56  ;;  %v1616_v56 = vsel %vm1385_vm5, %v3179_v55, 0 }
 0x24d   : > { %1265 = vmatprep.subr.bf16.mxu1 %v3890_v2 }
 0x250   : > { %1266 = vmatpush1.bf16.msra.mxu1 %v3678_v57  ;;  %v3735_v57 = vld [vmem:[%s4687_s2 + $0x10c] ss:$8 sps:$4 sm:$0xff]  }
 0x251   : > { %1267 = vmatprep.subr.bf16.mxu1 %v3890_v2 }
 0x254   : > { %1268 = vmatpush1.bf16.msra.mxu1 %v3679_v58 }
 0x255   : > { %1269 = vmatprep.subr.bf16.mxu1 %v3890_v2 }
 0x258   : > { %1270 = vmatpush1.bf16.msra.mxu1 %v3680_v59 }
 0x259   : > { %1271 = vmatprep.subr.bf16.mxu1 %v3890_v2 }
 0x25c   : > { %1272 = vmatpush1.bf16.msra.mxu1 %v1249_v61 }
 0x25f   : > { %1284 = vmatmul.mubr.bf16.vlgmr.msra.gmra.mrb[20].mxu1 %v1028_v48  ;;  %v3722_v48 = vld [vmem:[%s4687_s2 + $0xd0] ss:$8 sps:$4 sm:$0xff]  }
 0x260   : > { %1990 = vmatprep.mubr.bf16.mxu1 %v3890_v2 }
 0x306   : > { %v1156_v14 = vpop.f32.mrb[16].mxu1 }
 0x307   : > { %v1158_v15 = vpop.f32.mrb[17].mxu1 }
 0x308   : > { %v1159_v16 = vpop.f32.mrb[18].mxu1 }
 0x309   : > { %v1161_v17 = vpop.f32.mrb[19].mxu1 }
 0x30a   : > { %v3753_v17 = vld [vmem:[%s4687_s2 + $0x170] ss:$8 sps:$4 sm:$0xff]  }
 0x332   : > { %v1285_v18 = vpop.f32.mrb[20].mxu1 }
 0x333   : > { %v1292_v19 = vmax.f32 %v1156_v14, %v1285_v18  ;;  %v1287_v20 = vpop.f32.mrb[21].mxu1  ;;  %v3750_v14 = vld [vmem:[%s4687_s2 + $0x160] ss:$8 sps:$4 sm:$0xff]   ;;  %v3758_v18 = vld [vmem:[%s4687_s2 + $0x184] ss:$8 sps:$4 sm:$0xff]  }
 0x334   : > { %v1288_v21 = vpop.f32.mrb[22].mxu1  ;;  %v3761_v20 = vld [vmem:[%s4687_s2 + $0x194] ss:$8 sps:$4 sm:$0xff]  }
 0x335   : > { %1295 = vst.msk [vmem:[#allocation3] sm:$0xff] %vm1294_vm6, %v1292_v19  ;;  %v1293_v22 = vmax.f32 %v1159_v16, %v1288_v21  ;;  %v1290_v23 = vpop.f32.mrb[23].mxu1  ;;  %v3755_v16 = vld [vmem:[%s4687_s2 + $0x174] ss:$8 sps:$4 sm:$0xff]   ;;  %v3756_v19 = vld [vmem:[%s4687_s2 + $0x180] ss:$8 sps:$4 sm:$0xff]  }
 0x336   : > { %v3759_v21 = vld [vmem:[%s4687_s2 + $0x190] ss:$8 sps:$4 sm:$0xff]  }
 0x337   : > { %1297 = vst.msk [vmem:[#allocation3 + $0x8] sm:$0x3f] %vm1296_vm7, %v1293_v22  ;;  %v3764_v22 = vld [vmem:[%s4687_s2 + $0x1a4] ss:$8 sps:$4 sm:$0xff]   ;;  %v3218_v23 = vld [vmem:[%s4687_s2 + $0x1b0] sm:$0x33] }
 0x33c   : > { %v1298_v42 = vld [vmem:[#allocation3] sm:$0xff] }
 0x33e   : > { %v1312_v25 = vld [vmem:[#allocation3 + $0x1] sm:$0xff]  ;;  %v1313_v26 = vld [vmem:[#allocation3 + $0x9] sm:$0x3]  ;;  %v1669_v13 = vld [vmem:[#allocation3 + $0xb] sm:$0x3] }
 0x33f   : > { %v1314_v27 = vpack.c.bf16 %v1313_v26, %v1312_v25  ;;  %v1299_v41 = vld [vmem:[#allocation3 + $0x8] sm:$0x3]  ;;  %v1543_v59 = vld [vmem:[#allocation3 + $0xa] sm:$0x3]  ;;  %v3230_v25 = vcombine.high %v3218_v23, %v3218_v23  ;;  %v3229_v26 = vcombine.low %v3218_v23, %v3218_v23 }
 0x340   : > { %v1300_v44 = vpack.c.bf16 %v1299_v41, %v1298_v42  ;;  %v1542_v58 = vld [vmem:[#allocation3 + $0x2] sm:$0xff] }
 0x341   : > { %3143 = vmatmul.mubr.msk.bf16.vlgmr.msra.gmra.mrb[8].mxu0 %vm1294_vm6, %v1314_v27  ;;  %v1544_v61 = vpack.c.bf16 %v1543_v59, %v1542_v58  ;;  %v1668_v12 = vld [vmem:[#allocation3 + $0x3] sm:$0xff]  ;;  %v1868_v27 = vsel %vm1385_vm5, %v3229_v26, 0 }
 0x342   : > { %1500 = vmatpush1.bf16.msra.mxu0 %v3699_v24  ;;  %1531 = vmatprep.mubr.bf16.mxu0 %v3890_v2  ;;  %v1670_v15 = vpack.c.bf16 %v1669_v13, %v1668_v12  ;;  %v3762_v24 = vld [vmem:[%s4687_s2 + $0x1a0] ss:$8 sps:$4 sm:$0xff]  }
 0x343   : > { %1501 = vmatprep.subr.bf16.mxu0 %v3704_v28  ;;  %v1794_v28 = vld [vmem:[#allocation3 + $0x4] sm:$0xff] }
 0x344   : > { %v3780_v26 = vld [vmem:[%s4694_s9 + $0x68] sm:$0xff]  }
 0x346   : > { %1502 = vmatpush1.bf16.msra.mxu0 %v3702_v29  ;;  %v1795_v29 = vld [vmem:[#allocation3 + $0xc] sm:$0x3] }
 0x347   : > { %1503 = vmatprep.subr.bf16.mxu0 %v3707_v30  ;;  %v1796_v30 = vpack.c.bf16 %v1795_v29, %v1794_v28  ;;  %v3782_v28 = vld [vmem:[%s4694_s9 + $0x78] sm:$0xff]   ;;  %v3783_v29 = vld [vmem:[%s4694_s9 + $0x80] sm:$0xff]  }
 0x34a   : > { %1504 = vmatpush1.bf16.msra.mxu0 %v3705_v31 }
 0x34b   : > { %1505 = vmatprep.subr.bf16.mxu0 %v3710_v32 }
 0x34e   : > { %1506 = vmatpush1.bf16.msra.mxu0 %v3708_v33 }
 0x34f   : > { %1507 = vmatprep.subr.bf16.mxu0 %v3713_v34 }
 0x352   : > { %1508 = vmatpush1.bf16.msra.mxu0 %v3711_v36 }
 0x353   : > { %3156 = vmatprep.subr.msk.bf16.mxu0 %vm1385_vm5, %v3155_v37 }
 0x356   : > { %1510 = vmatpush1.bf16.msra.mxu0 %v1494_v39 }
 0x357   : > { %1621 = vmatprep.subr.bf16.mxu0 %v3718_v40 }
 0x359   : > { %3157 = vmatmul.mubr.msk.bf16.vlgmr.msra.gmra.mrb[8].mxu0 %vm1294_vm6, %v1300_v44 }
 0x35a   : > { %1622 = vmatpush1.bf16.msra.mxu0 %v3716_v43  ;;  %1653 = vmatprep.mubr.bf16.mxu0 %v3890_v2 }
 0x35b   : > { %1623 = vmatprep.subr.bf16.mxu0 %v3721_v45 }
 0x35e   : > { %1624 = vmatpush1.bf16.msra.mxu0 %v3719_v46 }
 0x35f   : > { %1625 = vmatprep.subr.bf16.mxu0 %v3724_v47 }
 0x362   : > { %1626 = vmatpush1.bf16.msra.mxu0 %v3722_v48 }
 0x363   : > { %1627 = vmatprep.subr.bf16.mxu0 %v3727_v49 }
 0x366   : > { %1628 = vmatpush1.bf16.msra.mxu0 %v3725_v50 }
 0x367   : > { %1629 = vmatprep.subr.bf16.mxu0 %v3730_v51 }
 0x36a   : > { %1630 = vmatpush1.bf16.msra.mxu0 %v3728_v53 }
 0x36b   : > { %3181 = vmatprep.subr.msk.bf16.mxu0 %vm1385_vm5, %v3180_v54 }
 0x36e   : > { %1632 = vmatpush1.bf16.msra.mxu0 %v1616_v56 }
 0x36f   : > { %1747 = vmatprep.subr.bf16.mxu0 %v3735_v57 }
 0x371   : > { %3182 = vmatmul.mubr.msk.bf16.vlgmr.msra.gmra.mrb[8].mxu0 %vm1294_vm6, %v1544_v61 }
 0x372   : > { %1748 = vmatpush1.bf16.msra.mxu0 %v3733_v60  ;;  %1779 = vmatprep.mubr.bf16.mxu0 %v3890_v2 }
 0x373   : > { %1749 = vmatprep.subr.bf16.mxu0 %v3738_v62  ;;  %v1946_v62 = vld [vmem:[%s4693_s8] sm:$0x7] }
 0x376   : > { %1750 = vmatpush1.bf16.msra.mxu0 %v3736_v63  ;;  %v3235_v63 = vld [vmem:[%s4693_s8 + $0x4] sm:$0x7] }
 0x377   : > { %1751 = vmatprep.subr.bf16.mxu0 %v3741_v0  ;;  %v3767_v0 = vld [vmem:[%s4694_s9] sm:$0xff]  }
 0x37a   : > { %1752 = vmatpush1.bf16.msra.mxu0 %v3739_v1  ;;  %v3768_v1 = vld [vmem:[%s4694_s9 + $0x8] sm:$0xff]  }
 0x37b   : > { %1753 = vmatprep.subr.bf16.mxu0 %v3744_v3  ;;  %v3769_v3 = vld [vmem:[%s4694_s9 + $0x10] sm:$0xff]  }
 0x37e   : > { %1754 = vmatpush1.bf16.msra.mxu0 %v3742_v4  ;;  %v3770_v4 = vld [vmem:[%s4694_s9 + $0x18] sm:$0xff]  }
 0x37f   : > { %1755 = vmatprep.subr.bf16.mxu0 %v3747_v5  ;;  %v3771_v5 = vld [vmem:[%s4694_s9 + $0x20] sm:$0xff]  }
 0x382   : > { %1756 = vmatpush1.bf16.msra.mxu0 %v3745_v7  ;;  %v3773_v7 = vld [vmem:[%s4694_s9 + $0x30] sm:$0xff]  }
 0x383   : > { %3206 = vmatprep.subr.msk.bf16.mxu0 %vm1385_vm5, %v3205_v8  ;;  %v3774_v8 = vld [vmem:[%s4694_s9 + $0x38] sm:$0xff]  }
 0x386   : > { %1758 = vmatpush1.bf16.msra.mxu0 %v1742_v10  ;;  %v3776_v10 = vld [vmem:[%s4694_s9 + $0x48] sm:$0xff]  }
 0x387   : > { %1873 = vmatprep.subr.bf16.mxu0 %v3752_v11 }
 0x389   : > { %3207 = vmatmul.mubr.msk.bf16.vlgmr.msra.gmra.mrb[8].mxu0 %vm1294_vm6, %v1670_v15 }
 0x38a   : > { %1874 = vmatpush1.bf16.msra.mxu0 %v3750_v14  ;;  %1905 = vmatprep.mubr.bf16.mxu0 %v3890_v2 }
 0x38b   : > { %1875 = vmatprep.subr.bf16.mxu0 %v3755_v16 }
 0x38e   : > { %1876 = vmatpush1.bf16.msra.mxu0 %v3753_v17 }
 0x38f   : > { %1877 = vmatprep.subr.bf16.mxu0 %v3758_v18 }
 0x392   : > { %1878 = vmatpush1.bf16.msra.mxu0 %v3756_v19 }
 0x393   : > { %1879 = vmatprep.subr.bf16.mxu0 %v3761_v20 }
 0x396   : > { %1880 = vmatpush1.bf16.msra.mxu0 %v3759_v21 }
 0x397   : > { %1881 = vmatprep.subr.bf16.mxu0 %v3764_v22  ;;  %v3777_v22 = vld [vmem:[%s4694_s9 + $0x50] sm:$0xff]  }
 0x39a   : > { %1882 = vmatpush1.bf16.msra.mxu0 %v3762_v24  ;;  %v3778_v24 = vld [vmem:[%s4694_s9 + $0x58] sm:$0xff]  }
 0x39b   : > { %3231 = vmatprep.subr.msk.bf16.mxu0 %vm1385_vm5, %v3230_v25  ;;  %v3779_v25 = vld [vmem:[%s4694_s9 + $0x60] sm:$0xff]  }
 0x39e   : > { %1884 = vmatpush1.bf16.msra.mxu0 %v1868_v27  ;;  %v3781_v27 = vld [vmem:[%s4694_s9 + $0x70] sm:$0xff]  }
 0x3a1   : > { %3232 = vmatmul.mubr.msk.bf16.vlgmr.msra.gmra.mrb[8].mxu0 %vm1294_vm6, %v1796_v30  ;;  %v3784_v30 = vld [vmem:[%s4694_s9 + $0x88] sm:$0xff]  }
 0x474   : > { %v1907_v31 = vpop.f32.mrb[8].mxu0 }
 0x475   : > { %v1920_v32 = vmax.f32 %v1907_v31, 0.0  ;;  %v1909_v33 = vpop.f32.mrb[9].mxu0  ;;  %v3785_v31 = vld [vmem:[%s4694_s9 + $0x90] sm:$0xff]  }
 0x476   : > { %v1921_v34 = vmax.f32 %v1909_v33, 0.0  ;;  %v1911_v35 = vpop.f32.mrb[10].mxu0  ;;  %v3787_v33 = vld [vmem:[%s4688_s3 + $0x28] sm:$0xff]  }
 0x477   : > { %v1924_v36 = vmul.f32 254.0, %v1920_v32  ;;  %v1922_v37 = vmax.f32 %v1911_v35, 0.0  ;;  %v1913_v38 = vpop.f32.mrb[11].mxu0  ;;  %v3786_v32 = vld [vmem:[%s4694_s9 + $0x98] sm:$0xff]   ;;  %v3788_v35 = vld [vmem:[%s4688_s3 + $0x30] sm:$0xff]  }
 0x478   : > { %v1925_v39 = vmul.f32 254.0, %v1921_v34  ;;  %v1923_v40 = vmax.f32 %v1913_v38, 0.0  ;;  %v3891_v34 = vmov 0.0  }
 0x479   : > { %v1928_v41 = vmul.f32 1.5258789e-05, %v1924_v36  ;;  %v1926_v42 = vmul.f32 254.0, %v1922_v37  ;;  %3416 = vmatprep.subr.bf16.mxu0 %v3891_v34  ;;  %v3790_v36 = vld [vmem:[%s4688_s3 + $0x40] sm:$0xff]   ;;  %3426 = vmatprep.mubr.msk.bf16.mxu0 %vm3892_vm10, %v3891_v34  ;;  %v3791_v37 = vld [vmem:[%s4688_s3 + $0x48] sm:$0xff]  }
 0x47a   : > { %v1929_v43 = vmul.f32 1.5258789e-05, %v1925_v39  ;;  %v1927_v44 = vmul.f32 254.0, %v1923_v40  ;;  %3417 = vmatpush3.bf16.msra.mxu0 %v3787_v33  ;;  %v3820_v33 = vld [vmem:[%s4690_s5] sm:$0xff]  }
 0x47b   : > { %v1932_v45 = vfloor.f32 %v1928_v41  ;;  %v1930_v46 = vmul.f32 1.5258789e-05, %v1926_v42  ;;  %3418 = vmatprep.subr.bf16.mxu0 %v3891_v34  ;;  %v3812_v42 = vld [vmem:[%s4689_s4] sm:$0xff]  }
 0x47c   : > { %v1933_v47 = vfloor.f32 %v1929_v43  ;;  %v1931_v48 = vmul.f32 1.5258789e-05, %v1927_v44  ;;  %v3813_v43 = vld [vmem:[%s4689_s4 + $0x8] sm:$0xff]   ;;  %v3814_v44 = vld [vmem:[%s4689_s4 + $0x10] sm:$0xff]  }
 0x47d   : > { %v1936_v49 = vmax.f32 %v1932_v45, -128.0  ;;  %v1934_v50 = vfloor.f32 %v1930_v46  ;;  %v3815_v45 = vld [vmem:[%s4689_s4 + $0x18] sm:$0xff]  }
 0x47e   : > { %v1937_v51 = vmax.f32 %v1933_v47, -128.0  ;;  %v1935_v52 = vfloor.f32 %v1931_v48  ;;  %3419 = vmatpush3.bf16.msra.mxu0 %v3788_v35 }
 0x47f   : > { %v1938_v53 = vmax.f32 %v1934_v50, -128.0  ;;  %v1940_v55 = vmin.f32 %v1936_v49, 127.0  ;;  %3420 = vmatprep.subr.bf16.mxu0 %v3891_v34 }
 0x480   : > { %v1939_v54 = vmax.f32 %v1935_v52, -128.0  ;;  %v1941_v57 = vmin.f32 %v1937_v51, 127.0  ;;  %v3792_v52 = vld [vmem:[%s4688_s3] sm:$0xff]  }
 0x481   : > { %v1942_v56 = vmin.f32 %v1938_v53, 127.0 }
 0x482   : > { %v1943_v58 = vmin.f32 %v1939_v54, 127.0  ;;  %v3793_v54 = vld [vmem:[%s4688_s3 + $0x8] sm:$0xff]  }
 0x483   : > { %v1944_v59 = vpack.c.bf16 %v1942_v56, %v1940_v55  ;;  %v3794_v55 = vld [vmem:[%s4688_s3 + $0x10] sm:$0xff]   ;;  %v3795_v56 = vld [vmem:[%s4688_s3 + $0x18] sm:$0xff]  }
 0x484   : > { %v1945_v60 = vpack.c.bf16 %v1943_v58, %v1941_v57  ;;  %v3796_v57 = vld [vmem:[%s4688_s3 + $0x20] sm:$0xff]  }
 0x485   : > { %v1953_v61 = vsel %vm1951_vm8, %v1944_v59, 0  ;;  %v3797_v59 = vld [vmem:[%s4688_s3 + $0x50] sm:$0xff]  }
 0x486   : > { %3233 = vmatprep.subr.msk.bf16.mxu1 %vm1951_vm8, %v1945_v60 }
 0x487   : > { %1959 = vmatpush1.bf16.msra.mxu1 %v1953_v61 }
 0x488   : > { %3236 = vmatprep.subr.msk.bf16.mxu1 %vm1951_vm8, %v1945_v60 }
 0x48a   : > { %3234 = vmatmul.mubr.msk.bf16.vlgmr.msra.gmra.mrb[24].mxu1 %vm1947_vm9, %v1946_v62  ;;  %v3799_v62 = vld [vmem:[%s4688_s3 + $0x60] sm:$0xff]  }
 0x48b   : > { %2005 = vmatpush1.bf16.msra.mxu1 %v1953_v61  ;;  %2036 = vmatprep.mubr.bf16.mxu1 %v3890_v2  ;;  %v3798_v61 = vld [vmem:[%s4688_s3 + $0x58] sm:$0xff]  }
 0x48c   : > { %2132 = vmatprep.subr.bf16.mxu1 %v3890_v2 }
 0x492   : > { %3237 = vmatmul.mubr.msk.bf16.vlgmr.msra.gmra.mrb[28].mxu1 %vm1947_vm9, %v3235_v63  ;;  %v3800_v63 = vld [vmem:[%s4688_s3 + $0x68] sm:$0xff]  }
 0x493   : > { %2133 = vmatpush1.bf16.msra.mxu1 %v3767_v0  ;;  %v3801_v0 = vld [vmem:[%s4688_s3 + $0x70] sm:$0xff]  }
 0x494   : > { %2134 = vmatprep.subr.bf16.mxu1 %v3890_v2 }
 0x497   : > { %2135 = vmatpush1.bf16.msra.mxu1 %v3768_v1 }
 0x498   : > { %2136 = vmatprep.subr.bf16.mxu1 %v3890_v2 }
 0x49b   : > { %2137 = vmatpush1.bf16.msra.mxu1 %v3769_v3  ;;  %v3802_v3 = vld [vmem:[%s4688_s3 + $0x78] sm:$0xff]  }
 0x49c   : > { %2138 = vmatprep.subr.bf16.mxu1 %v3890_v2 }
 0x49f   : > { %2139 = vmatpush1.bf16.msra.mxu1 %v3770_v4 }
 0x4a0   : > { %2140 = vmatprep.subr.bf16.mxu1 %v3890_v2 }
 0x4a3   : > { %2141 = vmatpush1.bf16.msra.mxu1 %v3771_v5  ;;  %v3803_v5 = vld [vmem:[%s4688_s3 + $0x80] sm:$0xff]  }
 0x4a4   : > { %2142 = vmatprep.subr.bf16.mxu1 %v3890_v2 }
 0x4a7   : > { %2143 = vmatpush1.bf16.msra.mxu1 %v3772_v6  ;;  %v3804_v6 = vld [vmem:[%s4688_s3 + $0x88] sm:$0xff]  }
 0x4a8   : > { %2144 = vmatprep.subr.bf16.mxu1 %v3890_v2 }
 0x4ab   : > { %2145 = vmatpush1.bf16.msra.mxu1 %v3773_v7  ;;  %v3805_v7 = vld [vmem:[%s4688_s3 + $0x90] sm:$0xff]  }
 0x4ac   : > { %2146 = vmatprep.subr.bf16.mxu1 %v3890_v2 }
 0x4af   : > { %2147 = vmatpush1.bf16.msra.mxu1 %v3774_v8  ;;  %v3806_v8 = vld [vmem:[%s4688_s3 + $0x98] sm:$0xff]  }
 0x4b0   : > { %2148 = vmatprep.subr.bf16.mxu1 %v3890_v2 }
 0x4b3   : > { %2149 = vmatpush1.bf16.msra.mxu1 %v3775_v9 }
 0x4b4   : > { %2150 = vmatprep.subr.bf16.mxu1 %v3890_v2 }
 0x4b7   : > { %2151 = vmatpush1.bf16.msra.mxu1 %v3776_v10  ;;  %v3807_v10 = vld [vmem:[%s4688_s3 + $0xa0] sm:$0xff]  }
 0x4b8   : > { %2253 = vmatprep.subr.bf16.mxu1 %v3890_v2 }
 0x55d   : > { %v1992_v11 = vpop.f32.mrb[24].mxu1 }
 0x55e   : > { %v1994_v12 = vpop.f32.mrb[25].mxu1 }
 0x55f   : > { %v1996_v13 = vpop.f32.mrb[26].mxu1 }
 0x560   : > { %v1997_v14 = vpop.f32.mrb[27].mxu1  ;;  %v3809_v13 = vld [vmem:[%s4688_s3 + $0xb0] sm:$0xff]  }
 0x561   : > { %v3810_v14 = vld [vmem:[%s4688_s3 + $0xb8] sm:$0xff]  }
 0x565   : > { %v2038_v15 = vpop.f32.mrb[28].mxu1 }
 0x566   : > { %v2045_v16 = vmax.f32 %v1992_v11, %v2038_v15  ;;  %v2040_v17 = vpop.f32.mrb[29].mxu1  ;;  %v3811_v15 = vld [vmem:[%s4688_s3 + $0xc0] sm:$0xff]  }
 0x567   : > { %v2046_v18 = vmax.f32 %v1994_v12, %v2040_v17  ;;  %v2042_v19 = vpop.f32.mrb[30].mxu1  ;;  %v3808_v12 = vld [vmem:[%s4688_s3 + $0xa8] sm:$0xff]  }
 0x568   : > { %v2043_v20 = vpop.f32.mrb[31].mxu1  ;;  %v2047_v23 = vpack.c.bf16 %v2045_v16, %v2045_v16  ;;  %v3817_v19 = vld [vmem:[%s4689_s4 + $0x28] sm:$0xff]  }
 0x569   : > { %v2048_v21 = vpack.c.bf16 %v2046_v18, %v2046_v18  ;;  %v3816_v18 = vld [vmem:[%s4689_s4 + $0x20] sm:$0xff]   ;;  %v3818_v20 = vld [vmem:[%s4689_s4 + $0x30] sm:$0xff]  }
 0x56b   : > { %3248 = vmatprep.mubr.msk.bf16.mxu1 %vm378_vm0, %v2048_v21 }
 0x56c   : > { %2165 = vmatmul.mubr.bf16.vlgmr.msra.gmra.mrb[32].mxu1 %v2047_v23 }
 0x56d   : > { %2254 = vmatpush1.bf16.msra.mxu1 %v3777_v22  ;;  %3279 = vmatprep.mubr.msk.bf16.mxu1 %vm378_vm0, %v2048_v21  ;;  %v3819_v21 = vld [vmem:[%s4689_s4 + $0x38] ss:$0 sps:$4 sm:$0xff]  }
 0x56e   : > { %2255 = vmatprep.subr.bf16.mxu1 %v3890_v2  ;;  %v2801_v22 = vsel %vm1118_vm3, %v3819_v21, 0 }
 0x571   : > { %2256 = vmatpush1.bf16.msra.mxu1 %v3778_v24 }
 0x572   : > { %2257 = vmatprep.subr.bf16.mxu1 %v3890_v2 }
 0x575   : > { %2258 = vmatpush1.bf16.msra.mxu1 %v3779_v25 }
 0x576   : > { %2259 = vmatprep.subr.bf16.mxu1 %v3890_v2 }
 0x579   : > { %2260 = vmatpush1.bf16.msra.mxu1 %v3780_v26 }
 0x57a   : > { %2261 = vmatprep.subr.bf16.mxu1 %v3890_v2 }
 0x57d   : > { %2262 = vmatpush1.bf16.msra.mxu1 %v3781_v27 }
 0x57e   : > { %2263 = vmatprep.subr.bf16.mxu1 %v3890_v2 }
 0x581   : > { %2264 = vmatpush1.bf16.msra.mxu1 %v3782_v28 }
 0x582   : > { %2265 = vmatprep.subr.bf16.mxu1 %v3890_v2 }
 0x585   : > { %2266 = vmatpush1.bf16.msra.mxu1 %v3783_v29 }
 0x586   : > { %2267 = vmatprep.subr.bf16.mxu1 %v3890_v2 }
 0x589   : > { %2268 = vmatpush1.bf16.msra.mxu1 %v3784_v30 }
 0x58a   : > { %2269 = vmatprep.subr.bf16.mxu1 %v3890_v2 }
 0x58d   : > { %2270 = vmatpush1.bf16.msra.mxu1 %v3785_v31 }
 0x58e   : > { %2271 = vmatprep.subr.bf16.mxu1 %v3890_v2  ;;  %v3789_v2 = vld [vmem:[%s4688_s3 + $0x38] sm:$0xff]  }
 0x58f   : > { %3421 = vmatpush3.bf16.msra.mxu0 %v3789_v2  ;;  %v3821_v2 = vld [vmem:[%s4690_s5 + $0x8] sm:$0xff]  }
 0x590   : > { %3422 = vmatprep.subr.bf16.mxu0 %v3891_v34 }
 0x591   : > { %2272 = vmatpush1.bf16.msra.mxu1 %v3786_v32 }
 0x592   : > { %3486 = vmatprep.subr.bf16.mxu1 %v3891_v34 }
 0x593   : > { %3423 = vmatpush3.bf16.msra.mxu0 %v3790_v36  ;;  %v3822_v36 = vld [vmem:[%s4690_s5 + $0x10] sm:$0xff]  }
 0x594   : > { %2286 = vmatmul.mubr.bf16.vlgmr.msra.gmra.mrb[36].mxu1 %v2047_v23  ;;  %3424 = vmatprep.subr.bf16.mxu0 %v3891_v34 }
 0x595   : > { %3502 = vmatprep.mubr.msk.bf16.mxu1 %vm3892_vm10, %v3891_v34  ;;  %3487 = vmatpush3.bf16.msra.mxu1 %v3812_v42 }
 0x596   : > { %3488 = vmatprep.subr.bf16.mxu1 %v3891_v34 }
 0x597   : > { %3425 = vmatpush3.bf16.msra.mxu0 %v3791_v37  ;;  %v3823_v37 = vld [vmem:[%s4690_s5 + $0x18] sm:$0xff]  }
 0x598   : > { %3430 = vmatprep.subr.bf16.mxu0 %v3891_v34 }
 0x599   : > { %3489 = vmatpush3.bf16.msra.mxu1 %v3813_v43 }
 0x59a   : > { %3490 = vmatprep.subr.bf16.mxu1 %v3891_v34 }
 0x59d   : > { %3491 = vmatpush3.bf16.msra.mxu1 %v3814_v44 }
 0x59e   : > { %3492 = vmatprep.subr.bf16.mxu1 %v3891_v34 }
 0x5a1   : > { %3493 = vmatpush3.bf16.msra.mxu1 %v3815_v45 }
 0x5a2   : > { %3494 = vmatprep.subr.bf16.mxu1 %v3891_v34 }
 0x5a5   : > { %3495 = vmatpush3.bf16.msra.mxu1 %v3816_v18 }
 0x5a6   : > { %3496 = vmatprep.subr.bf16.mxu1 %v3891_v34 }
 0x5a9   : > { %3497 = vmatpush3.bf16.msra.mxu1 %v3817_v19 }
 0x5aa   : > { %3498 = vmatprep.subr.bf16.mxu1 %v3891_v34 }
 0x5ad   : > { %3499 = vmatpush3.bf16.msra.mxu1 %v3818_v20 }
 0x5ae   : > { %3500 = vmatprep.subr.bf16.mxu1 %v3891_v34 }
 0x5b1   : > { %3501 = vmatpush3.bf16.msra.mxu1 %v2801_v22 }
 0x5b2   : > { %3506 = vmatprep.subr.bf16.mxu1 %v3891_v34 }
 0x63f   : > { %v2166_v38 = vpop.f32.mrb[32].mxu1 }
 0x640   : > { %v2168_v39 = vpop.f32.mrb[33].mxu1 }
 0x641   : > { %v2169_v40 = vpop.f32.mrb[34].mxu1  ;;  %v3825_v39 = vld [vmem:[%s4690_s5 + $0x28] ss:$0 sps:$4 sm:$0x33]  }
 0x642   : > { %v2170_v41 = vpop.f32.mrb[35].mxu1  ;;  %v2898_v40 = vsel %vm1385_vm5, %v3825_v39, 0 }
 0x667   : > { %v2287_v46 = vpop.f32.mrb[36].mxu1 }
 0x668   : > { %v2293_v47 = vmax.f32 %v2166_v38, %v2287_v46  ;;  %v2289_v48 = vpop.f32.mrb[37].mxu1  ;;  %v3824_v38 = vld [vmem:[%s4690_s5 + $0x20] sm:$0xff]  }
 0x669   : > { %v2290_v49 = vpop.f32.mrb[38].mxu1 }
 0x66a   : > { %2295 = vst.msk [vmem:[#allocation4] sm:$0x1f] %vm2294_vm11, %v2293_v47  ;;  %v2291_v50 = vpop.f32.mrb[39].mxu1 }
 0x671   : > { %v2308_v51 = vld [vmem:[#allocation4 + $0x1] sm:$0x1]  ;;  %v2296_v58 = vld [vmem:[#allocation4] sm:$0x1]  ;;  %v2468_v1 = vld [vmem:[#allocation4 + $0x2] sm:$0x1] }
 0x672   : > { %v2309_v53 = vpack.c.bf16 %v2308_v51, %v2308_v51  ;;  %v2297_v60 = vpack.c.bf16 %v2296_v58, %v2296_v58  ;;  %v2469_v4 = vpack.c.bf16 %v2468_v1, %v2468_v1  ;;  %v2555_v9 = vld [vmem:[#allocation4 + $0x3] sm:$0x1]  ;;  %v2642_v16 = vld [vmem:[#allocation4 + $0x4] sm:$0x1] }
 0x673   : > { %v2556_v11 = vpack.c.bf16 %v2555_v9, %v2555_v9  ;;  %v2643_v17 = vpack.c.bf16 %v2642_v16, %v2642_v16 }
 0x674   : > { %3427 = vmatmul.mubr.msk.bf16.vlgmr.msra.gmra.mrb[12].mxu0 %vm2351_vm12, %v2309_v53 }
 0x675   : > { %3431 = vmatpush3.bf16.msra.mxu0 %v3792_v52  ;;  %3440 = vmatprep.mubr.msk.bf16.mxu0 %vm3892_vm10, %v3891_v34 }
 0x676   : > { %3432 = vmatprep.subr.bf16.mxu0 %v3891_v34 }
 0x679   : > { %3433 = vmatpush3.bf16.msra.mxu0 %v3793_v54 }
 0x67a   : > { %3434 = vmatprep.subr.bf16.mxu0 %v3891_v34 }
 0x67d   : > { %3435 = vmatpush3.bf16.msra.mxu0 %v3794_v55 }
 0x67e   : > { %3436 = vmatprep.subr.bf16.mxu0 %v3891_v34 }
 0x681   : > { %3437 = vmatpush3.bf16.msra.mxu0 %v3795_v56 }
 0x682   : > { %3438 = vmatprep.subr.bf16.mxu0 %v3891_v34 }
 0x685   : > { %3439 = vmatpush3.bf16.msra.mxu0 %v3796_v57 }
 0x686   : > { %3444 = vmatprep.subr.bf16.mxu0 %v3891_v34 }
 0x688   : > { %3441 = vmatmul.mubr.msk.bf16.vlgmr.msra.gmra.mrb[12].mxu0 %vm2351_vm12, %v2297_v60 }
 0x689   : > { %3445 = vmatpush3.bf16.msra.mxu0 %v3797_v59  ;;  %3454 = vmatprep.mubr.msk.bf16.mxu0 %vm3892_vm10, %v3891_v34 }
 0x68a   : > { %3446 = vmatprep.subr.bf16.mxu0 %v3891_v34 }
 0x68d   : > { %3447 = vmatpush3.bf16.msra.mxu0 %v3798_v61 }
 0x68e   : > { %3448 = vmatprep.subr.bf16.mxu0 %v3891_v34 }
 0x691   : > { %3449 = vmatpush3.bf16.msra.mxu0 %v3799_v62 }
 0x692   : > { %3450 = vmatprep.subr.bf16.mxu0 %v3891_v34 }
 0x695   : > { %3451 = vmatpush3.bf16.msra.mxu0 %v3800_v63 }
 0x696   : > { %3452 = vmatprep.subr.bf16.mxu0 %v3891_v34 }
 0x699   : > { %3453 = vmatpush3.bf16.msra.mxu0 %v3801_v0 }
 0x69a   : > { %3458 = vmatprep.subr.bf16.mxu0 %v3891_v34 }
 0x69c   : > { %3455 = vmatmul.mubr.msk.bf16.vlgmr.msra.gmra.mrb[12].mxu0 %vm2351_vm12, %v2469_v4 }
 0x69d   : > { %3459 = vmatpush3.bf16.msra.mxu0 %v3802_v3  ;;  %3468 = vmatprep.mubr.msk.bf16.mxu0 %vm3892_vm10, %v3891_v34 }
 0x69e   : > { %3460 = vmatprep.subr.bf16.mxu0 %v3891_v34 }
 0x6a1   : > { %3461 = vmatpush3.bf16.msra.mxu0 %v3803_v5 }
 0x6a2   : > { %3462 = vmatprep.subr.bf16.mxu0 %v3891_v34 }
 0x6a5   : > { %3463 = vmatpush3.bf16.msra.mxu0 %v3804_v6 }
 0x6a6   : > { %3464 = vmatprep.subr.bf16.mxu0 %v3891_v34 }
 0x6a9   : > { %3465 = vmatpush3.bf16.msra.mxu0 %v3805_v7 }
 0x6aa   : > { %3466 = vmatprep.subr.bf16.mxu0 %v3891_v34 }
 0x6ad   : > { %3467 = vmatpush3.bf16.msra.mxu0 %v3806_v8 }
 0x6ae   : > { %3472 = vmatprep.subr.bf16.mxu0 %v3891_v34 }
 0x6b0   : > { %3469 = vmatmul.mubr.msk.bf16.vlgmr.msra.gmra.mrb[12].mxu0 %vm2351_vm12, %v2556_v11 }
 0x6b1   : > { %3473 = vmatpush3.bf16.msra.mxu0 %v3807_v10  ;;  %3482 = vmatprep.mubr.msk.bf16.mxu0 %vm3892_vm10, %v3891_v34 }
 0x6b2   : > { %3474 = vmatprep.subr.bf16.mxu0 %v3891_v34 }
 0x6b5   : > { %3475 = vmatpush3.bf16.msra.mxu0 %v3808_v12 }
 0x6b6   : > { %3476 = vmatprep.subr.bf16.mxu0 %v3891_v34 }
 0x6b9   : > { %3477 = vmatpush3.bf16.msra.mxu0 %v3809_v13 }
 0x6ba   : > { %3478 = vmatprep.subr.bf16.mxu0 %v3891_v34 }
 0x6bd   : > { %3479 = vmatpush3.bf16.msra.mxu0 %v3810_v14 }
 0x6be   : > { %3480 = vmatprep.subr.bf16.mxu0 %v3891_v34 }
 0x6c1   : > { %3481 = vmatpush3.bf16.msra.mxu0 %v3811_v15 }
 0x6c4   : > { %3483 = vmatmul.mubr.msk.bf16.vlgmr.msra.gmra.mrb[12].mxu0 %vm2351_vm12, %v2643_v17 }
 0x797   : > { %v2722_v23 = vpop.f32.mrb[12].mxu0 }
 0x798   : > { %v2729_v24 = vmax.f32 %v2722_v23, 0.0  ;;  %v3484_v25 = vpop.f32.mrb[13].mxu0 }
 0x799   : > { %v2725_v26 = vpop.f32.mrb[14].mxu0 }
 0x79a   : > { %v2730_v27 = vmul.f32 122.0, %v2729_v24  ;;  %v3485_v28 = vpop.f32.mrb[15].mxu0 }
 0x79c   : > { %v2731_v29 = vmul.f32 1.5258789e-05, %v2730_v27 }
 0x79e   : > { %v2732_v30 = vfloor.f32 %v2731_v29 }
 0x7a0   : > { %v2733_v31 = vmax.f32 %v2732_v30, -128.0 }
 0x7a2   : > { %v2734_v32 = vmin.f32 %v2733_v31, 127.0 }
 0x7a4   : > { %v2735_v35 = vpack.c.bf16 %v2734_v32, %v2734_v32 }
 0x7a6   : > { %3503 = vmatmul.mubr.msk.bf16.vlgmr.msra.gmra.mrb[40].mxu1 %vm2796_vm13, %v2735_v35 }
 0x7a7   : > { %3507 = vmatpush3.bf16.msra.mxu1 %v3820_v33  ;;  %3518 = vmatprep.mubr.msk.bf16.mxu1 %vm3892_vm10, %v3891_v34 }
 0x7a8   : > { %3508 = vmatprep.subr.bf16.mxu1 %v3891_v34 }
 0x7ab   : > { %3509 = vmatpush3.bf16.msra.mxu1 %v3821_v2 }
 0x7ac   : > { %3510 = vmatprep.subr.bf16.mxu1 %v3891_v34 }
 0x7af   : > { %3511 = vmatpush3.bf16.msra.mxu1 %v3822_v36 }
 0x7b0   : > { %3512 = vmatprep.subr.bf16.mxu1 %v3891_v34 }
 0x7b3   : > { %3513 = vmatpush3.bf16.msra.mxu1 %v3823_v37 }
 0x7b4   : > { %3514 = vmatprep.subr.bf16.mxu1 %v3891_v34 }
 0x7b7   : > { %3515 = vmatpush3.bf16.msra.mxu1 %v3824_v38 }
 0x7b8   : > { %3516 = vmatprep.subr.bf16.mxu1 %v3891_v34 }
 0x7bb   : > { %3517 = vmatpush3.bf16.msra.mxu1 %v2898_v40 }
 0x879   : > { %v2837_v41 = vpop.f32.mrb[40].mxu1 }
 0x87a   : > { %v2843_v42 = vmax.f32 %v2837_v41, 0.0  ;;  %v3504_v43 = vpop.f32.mrb[41].mxu1 }
 0x87b   : > { %v2840_v44 = vpop.f32.mrb[42].mxu1 }
 0x87c   : > { %v2844_v45 = vmul.f32 369.0, %v2843_v42  ;;  %v3505_v46 = vpop.f32.mrb[43].mxu1 }
 0x87e   : > { %v2845_v47 = vmul.f32 1.5258789e-05, %v2844_v45 }
 0x880   : > { %v2846_v48 = vfloor.f32 %v2845_v47 }
 0x882   : > { %v2847_v49 = vmax.f32 %v2846_v48, -128.0 }
 0x884   : > { %v2848_v50 = vmin.f32 %v2847_v49, 127.0 }
 0x886   : > { %v2849_v34 = vpack.c.bf16 %v2848_v50, %v2848_v50 }
 0x888   : > { %3519 = vmatmul.mubr.msk.bf16.vlgmr.msra.gmra.mrb[44].mxu1 %vm1294_vm6, %v2849_v34 }
 0x95b   : > { %v2934_v51 = vpop.f32.mrb[44].mxu1 }
 0x95c   : > { %v2940_v52 = vmul.f32 386.0, %v2934_v51  ;;  %v3520_v53 = vpop.f32.mrb[45].mxu1 }
 0x95d   : > { %v2937_v54 = vpop.f32.mrb[46].mxu1 }
 0x95e   : > { %v2941_v55 = vmul.f32 1.5258789e-05, %v2940_v52  ;;  %v3521_v56 = vpop.f32.mrb[47].mxu1 }
 0x960   : > { %v2942_v57 = vfloor.f32 %v2941_v55 }
 0x962   : > { %v2943_v58 = vmax.f32 %v2942_v57, -128.0 }
 0x964   : > { %v2944_v59 = vmin.f32 %v2943_v58, 127.0 }
 0x966   : > { %2945 = vst [vmem:[%s351_s18] sm:$0x1] %v2944_v59 }
 0x967   : > { %3839 = shalt.err (!%p3836_p3)
}
 0x968   : > { %s3840_s11 = scalar_lea.hbm %s4643_s26, 16  ;;  %s3844_s21 = scalar_lea.hbm %s4695_s10, 32 }
 0x969   : > { %p3841_p4 = scmp.ne.s32.totalorder %s4643_s26, %s3840_s11  ;;  %p3845_p9 = scmp.lt.u32.totalorder %s4643_s26, %s4695_s10 }
 0x96a   : > { %p3846_p10 = scmp.lt.u32.totalorder %s3844_s21, %s3840_s11  ;;  %p3848_p12 = scmp.lt.u32.totalorder %s3840_s11, %s4643_s26 }
 0x96b   : > { %p3842_p7 = pnand %p3841_p4, %p3987_p5 }
 0x96c   : > { %p3847_p11 = por %p3846_p10, %p3845_p9 }
 0x96d   : > { %p3843_p8 = pneg %p3842_p7 }
 0x96e   : > { %p3849_p13 = por %p3848_p12, %p3847_p11 }
 0x970   : > { %p3850_p0 = pnand %p3849_p13, %p3843_p8 }
 0x972   : > { %3853 = shalt.err (!%p3850_p0)
}
 0x973   : > { %3586 = dma.vmem_to_hbm [thread:$0]  (%p3987_p5), %s4645_s20, 16, %s4643_s26, %s2947_s27  }
 0x974 PF: > { %p3592_p1 = scmp.ge.s32.totalorder %s3888_s16, 2  ;;  %s2971_s28 = sand.u32 1, %s3876_s13  }
 0x975   : > { %s2972_s29 = scalar_lea.sflag [#allocation6], %s2971_s28 }
 0x976   : > { %p3589_p2 = pnand %p3592_p1, %p3991_p6 }
 0x978   : > { %3871 = dma.done.wait (!%p3589_p2), %s2972_s29, 16  }
 0x979   : > { %3873 = vsyncadd (!%p3589_p2), %s2972_s29, 4294967280  ;;  %p20_p3 = scmp.ge.s32.totalorder %s3974_s19, 4   ;;  %s4698_s13 = smov %s3880_s14 }
 0x97a   : > { %s4699_s14 = smov %s3884_s15  ;;  %s4700_s15 = smov %s3985_s22 }
 0x97b   : > { %s4701_s16 = smov %s3974_s19  ;;  %22 = sbr.rel (!%p20_p3) target bundleno = 3 (0x3), region = 111 }
 0x982   :  { %2976 = vsyncpa [#allocation6], 1 }
 0x983   :  { %2978 = vsyncpa [#allocation6 + $0x1], 1 }

</bundles_post_ra>
